<compile_context>
chip_gen: v5e
topology: v5e:2x2
jax: 0.10.0
libtpu: 0.0.40
codegen_flags: <defaults>
</compile_context>

<pallas_src>
import jax
import jax.numpy as jnp
from jax.experimental import pallas as pl
from jax.experimental.pallas import tpu as pltpu

EPS = 1e-5          # PyTorch BatchNorm eps
NEG_SLOPE = 0.01    # PyTorch LeakyReLU default negative_slope
LIQUID_UNITS = 20
LIQUID_OUT = 6      # LiquidBlock(out_features=6)
FLAT_OUT = 10       # LazyLinear(out_features=10)

K1, P1 = 5, 2               # conv1 / conv2: kernel 5, pad 2, stride 1
K3, P3 = 3, 1               # conv3: kernel 3, pad 1, stride 1
POOL_K, POOL_S, POOL_P = 5, 2, 2
PACK = 128                  # lane width of packed (log_probs | hx) output block

# Row layout of the packed BN-scale/shift + bias operand (rows padded to 128 lanes).
R_S1, R_T1, R_S2, R_T2, R_S3, R_T3 = 0, 1, 2, 3, 4, 5
R_SF, R_TF, R_S1H, R_T1H, R_S2H, R_T2H, R_B4 = 6, 7, 8, 9, 10, 11, 12
_N_BN_ROWS = 16


def _round_up(a, m):
    return (a + m - 1) // m * m


def _leaky_relu(x):
    return jnp.where(x > 0, x, NEG_SLOPE * x)


def _pool_out_len(L):
    return (L + 2 * POOL_P - POOL_K) // POOL_S + 1


# ------------------------------ fused kernel --------------------------------
def _make_fused_kernel(BB, L1, T, U, n_motor, num_classes):
    """BB: batch block (multiple of 8), L1: conv spatial length (= eeg_channels),
    T: CfC time steps (= seq_length), U: liquid units."""
    f32, bf16 = jnp.float32, jnp.bfloat16
    L2 = _pool_out_len(L1)
    N1 = L1 * BB                       # conv1/conv2 output rows (all valid)
    N3 = L2 * BB                       # conv3 output rows
    Lp2 = L1 + 2 * P1                  # conv2 padded input positions
    Lp3 = L2 + 2 * P3                  # conv3 padded input positions
    n_pool = L1 + 2 * POOL_P - POOL_K + 1   # full-stride pooled positions

    def kernel(xs_ref, xl_ref,
               w1_ref, w2_ref, w3_ref, wfc_ref,
               wx4_ref, wh4_ref,
               w1ha_ref, w1hb_ref, w2h_ref, bnv_ref,
               out_ref,
               h2_ref, h3_ref):

        def vec(row, width):                       # (1, width) f32 broadcast row
            return bnv_ref[row:row + 1, 0:width]

        # -------- conv1: one im2col matmul (im2col built in the wrapper) ----------
        y1 = jnp.dot(xs_ref[...], w1_ref[...], preferred_element_type=f32)
        y1 = jnp.maximum(y1 * vec(R_S1, 64) + vec(R_T1, 64), 0.0)   # BN1(+bias), ReLU

        # -------- conv2 (k5,p2): zero-padded VMEM slab + K tap matmuls ------------
        h2_ref[0:P1 * BB, :] = jnp.zeros((P1 * BB, 64), bf16)
        h2_ref[(P1 + L1) * BB:Lp2 * BB, :] = jnp.zeros((P1 * BB, 64), bf16)
        h2_ref[P1 * BB:(P1 + L1) * BB, :] = y1.astype(bf16)
        acc = jnp.zeros((N1, 64), f32)
        for k in range(K1):
            acc = acc + jnp.dot(h2_ref[k * BB:k * BB + N1, :], w2_ref[k],
                                preferred_element_type=f32)
        y2 = jnp.maximum(acc * vec(R_S2, 64) + vec(R_T2, 64), 0.0)  # BN2(+bias), ReLU

        # -------- MaxPool1d(k5,s2,p2): whole-slab maxima + static stride-2 select --
        ninf = jnp.full((POOL_P * BB, 64), -jnp.inf, f32)
        y2p = jnp.concatenate([ninf, y2, ninf], axis=0)
        pooled_full = y2p[0:n_pool * BB, :]
        for w in range(1, POOL_K):
            pooled_full = jnp.maximum(pooled_full, y2p[w * BB:(w + n_pool) * BB, :])
        pooled = jnp.concatenate(
            [pooled_full[2 * j * BB:(2 * j + 1) * BB, :] for j in range(L2)], axis=0)

        # -------- conv3 (k3,p1): zero-padded VMEM slab + K tap matmuls ------------
        h3_ref[0:P3 * BB, :] = jnp.zeros((P3 * BB, 64), bf16)
        h3_ref[(P3 + L2) * BB:Lp3 * BB, :] = jnp.zeros((P3 * BB, 64), bf16)
        h3_ref[P3 * BB:(P3 + L2) * BB, :] = pooled.astype(bf16)
        acc3 = jnp.zeros((N3, 24), f32)
        for k in range(K3):
            acc3 = acc3 + jnp.dot(h3_ref[k * BB:k * BB + N3, :], w3_ref[k],
                                  preferred_element_type=f32)
        y3 = jnp.maximum(acc3 * vec(R_S3, 24) + vec(R_T3, 24), 0.0)  # BN3(+bias), ReLU

        # -------- Flatten + LazyLinear(10) + BN + LeakyReLU -----------------------
        # wfc is pre-permuted to (L2, 24, 10) so PyTorch's channel-major flatten
        # ordering is honored by per-position matmuls.
        s_acc = jnp.zeros((BB, FLAT_OUT), f32)
        for j in range(L2):
            s_acc = s_acc + jnp.dot(y3[j * BB:(j + 1) * BB, :].astype(bf16),
                                    wfc_ref[j], preferred_element_type=f32)
        s_flat = _leaky_relu(s_acc * vec(R_SF, FLAT_OUT) + vec(R_TF, FLAT_OUT))

        # -------- liquid (CfC) branch ---------------------------------------------
        # TODO(synk): the ncps AutoNCP wiring sparsity masks and the CfC backbone MLP
        # are not reproduced; a dense default-mode CfC cell with U hidden units and
        # motor readout = last n_motor units is used instead.
        b4 = vec(R_B4, 4 * U)
        xp = jnp.dot(xl_ref[...], wx4_ref[...], preferred_element_type=f32) + b4
        wh4 = wh4_ref[...]
        h = jnp.zeros((BB, U), f32)          # forward() passes state=None -> zero init
        for t in range(T):   # TODO(synk): switch to lax.fori_loop if T grows large
            g = xp[t * BB:(t + 1) * BB, :] + jnp.dot(h.astype(bf16), wh4,
                                                     preferred_element_type=f32)
            ff1 = jnp.tanh(g[:, 0:U])
            ff2 = jnp.tanh(g[:, U:2 * U])
            t_gate = jax.nn.sigmoid(g[:, 2 * U:3 * U] + g[:, 3 * U:4 * U])  # ts = 1.0
            h = ff1 * (1.0 - t_gate) + t_gate * ff2
        t_out = h[:, U - n_motor:]           # motor neurons

        # -------- head: cat -> Linear(64) -> BN -> Linear(nc) -> BN -> LogSoftmax --
        # torch.cat((s_flat, t), 1) @ W1.T, with W1 pre-split into two operands.
        z = (jnp.dot(s_flat.astype(bf16), w1ha_ref[...], preferred_element_type=f32)
             + jnp.dot(t_out.astype(bf16), w1hb_ref[...], preferred_element_type=f32))
        z = _leaky_relu(z * vec(R_S1H, 64) + vec(R_T1H, 64))          # BN(64)+LeakyReLU
        z = jnp.dot(z.astype(bf16), w2h_ref[...], preferred_element_type=f32)
        z = _leaky_relu(z * vec(R_S2H, num_classes) + vec(R_T2H, num_classes))
        m = jnp.max(z, axis=1, keepdims=True)
        lse = jnp.log(jnp.sum(jnp.exp(z - m), axis=1, keepdims=True)) + m

        # packed output block: lanes [0,nc) = log_probs, [nc, nc+U) = hx
        out_ref[:, 0:num_classes] = z - lse
        out_ref[:, num_classes:num_classes + U] = h

    return kernel


# --------------------------------- wrapper -----------------------------------
def _full_spec(arr):
    nd = arr.ndim
    return pl.BlockSpec(arr.shape, lambda i, _nd=nd: (0,) * _nd)


@jax.jit
def parallel_conv_liquid_forward(x, p):
    """x: (B, seq_length, eeg_channels) float32 — same tensor feeds both branches."""
    x = x.astype(jnp.float32)
    B, T, F = x.shape                  # T = seq_length, F = eeg_channels
    S, L1 = T, F                       # conv: in_channels = seq_length, spatial = eeg
    L2 = _pool_out_len(L1)
    U = p['wh4'].shape[0]
    num_classes = p['w2h'].shape[1]
    assert num_classes + U <= PACK

    # Batch block: multiple of 8 (sublane/MXU-M fill); force >=2 grid steps so the
    # "parallel" grid axis actually engages both v7x TensorCores.
    BB = min(64, _round_up(max(B // 2, 1), 8))
    nb = max(2, _round_up(B, BB) // BB)
    B_pad = nb * BB
    x_pad = jnp.pad(x, ((0, B_pad - B), (0, 0), (0, 0)))

    # Conv branch: wrapper-side im2col in (position*BB + batch) row layout, bf16.
    xcl = jnp.transpose(x_pad, (0, 2, 1))                  # (B_pad, L1, S)
    xcp = jnp.pad(xcl, ((0, 0), (P1, P1), (0, 0)))         # zero spatial padding
    cols = jnp.concatenate([xcp[:, k:k + L1, :] for k in range(K1)], axis=2)
    xs = (cols.reshape(nb, BB, L1, K1 * S).transpose(0, 2, 1, 3)
              .reshape(nb * L1 * BB, K1 * S).astype(jnp.bfloat16))

    # Liquid branch: (time*BB + batch) row layout, bf16.
    xl = (x_pad.reshape(nb, BB, T, F).transpose(0, 2, 1, 3)
               .reshape(nb * T * BB, F).astype(jnp.bfloat16))

    weights = (p['w1i'], p['w2'], p['w3'], p['wfc'], p['wx4'], p['wh4'],
               p['w1ha'], p['w1hb'], p['w2h'], p['bnv'])

    kernel = _make_fused_kernel(BB, L1, T, U, LIQUID_OUT, num_classes)

    in_specs = ([pl.BlockSpec((L1 * BB, K1 * S), lambda i: (i, 0)),
                 pl.BlockSpec((T * BB, F), lambda i: (i, 0))]
                + [_full_spec(w) for w in weights])

    packed = pl.pallas_call(
        kernel,
        out_shape=jax.ShapeDtypeStruct((B_pad, PACK), jnp.float32),
        grid=(nb,),
        in_specs=in_specs,
        out_specs=pl.BlockSpec((BB, PACK), lambda i: (i, 0)),
        scratch_shapes=[pltpu.VMEM(((L1 + 2 * P1) * BB, 64), jnp.bfloat16),
                        pltpu.VMEM(((L2 + 2 * P3) * BB, 64), jnp.bfloat16)],
        compiler_params=pltpu.CompilerParams(
            dimension_semantics=("parallel",)),
    )(xs, xl, *weights)

    log_probs = packed[:B, :num_classes]
    hx = packed[:B, num_classes:num_classes + U]
    return log_probs, hx


# ------------------------------ parameter init --------------------------------
def init_params(key, *, seq_length, eeg_channels, num_classes,
                liquid_units=LIQUID_UNITS, liquid_out=LIQUID_OUT):
    ks = iter(jax.random.split(key, 32))
    bf16 = jnp.bfloat16

    def w(shape, scale=0.1):
        return scale * jax.random.normal(next(ks), shape, dtype=jnp.float32)

    def bn_fold(c, bias):
        # PyTorch eval-mode BN defaults: gamma=1, beta=0, running_mean=0, running_var=1.
        # For a trained checkpoint, substitute the real statistics here.
        gamma = jnp.ones((c,), jnp.float32)
        beta = jnp.zeros((c,), jnp.float32)
        mean = jnp.zeros((c,), jnp.float32)
        var = jnp.ones((c,), jnp.float32)
        scale = gamma * jax.lax.rsqrt(var + EPS)
        shift = beta - mean * scale
        return scale, shift + bias.reshape(-1) * scale   # fold preceding layer's bias

    S, L1, F, U = seq_length, eeg_channels, eeg_channels, liquid_units
    L2 = _pool_out_len(L1)

    p = {}
    # ConvolutionalBlock — PyTorch (C_out, C_in, K) weights permuted to (K, C_in, C_out).
    w1_pt = w((64, S, K1))
    p['w1i'] = jnp.transpose(w1_pt, (2, 1, 0)).reshape(K1 * S, 64).astype(bf16)
    s1, t1 = bn_fold(64, w((64,)))
    w2_pt = w((64, 64, K1))
    p['w2'] = jnp.transpose(w2_pt, (2, 1, 0)).astype(bf16)
    s2, t2 = bn_fold(64, w((64,)))
    w3_pt = w((24, 64, K3))
    p['w3'] = jnp.transpose(w3_pt, (2, 1, 0)).astype(bf16)
    s3, t3 = bn_fold(24, w((24,)))

    # Flatten + LazyLinear(10): PyTorch flatten index = channel * L2 + position.
    wfc_pt = w((FLAT_OUT, 24 * L2))
    p['wfc'] = jnp.transpose(wfc_pt.reshape(FLAT_OUT, 24, L2), (2, 1, 0)).astype(bf16)
    sf, tf = bn_fold(FLAT_OUT, w((FLAT_OUT,)))

    # LiquidBlock (simplified dense CfC cell): gates [ff1 | ff2 | time_a | time_b].
    p['wx4'] = w((F, 4 * U)).astype(bf16)
    p['wh4'] = w((U, 4 * U)).astype(bf16)
    b4 = w((4 * U,))

    # Final MLP head (biases folded into BN shifts); W1 pre-split at the concat boundary.
    w1h_pt = w((64, FLAT_OUT + liquid_out))
    p['w1ha'] = jnp.transpose(w1h_pt[:, :FLAT_OUT]).astype(bf16)   # (10, 64)
    p['w1hb'] = jnp.transpose(w1h_pt[:, FLAT_OUT:]).astype(bf16)   # (6, 64)
    s1h, t1h = bn_fold(64, w((64,)))
    w2h_pt = w((num_classes, 64))
    p['w2h'] = jnp.transpose(w2h_pt).astype(bf16)                  # (64, nc)
    s2h, t2h = bn_fold(num_classes, w((num_classes,)))

    # Pack all (1,C) BN scale/shift vectors + the CfC bias into one (16,128) operand.
    vecs = [None] * 13
    vecs[R_S1], vecs[R_T1] = s1, t1
    vecs[R_S2], vecs[R_T2] = s2, t2
    vecs[R_S3], vecs[R_T3] = s3, t3
    vecs[R_SF], vecs[R_TF] = sf, tf
    vecs[R_S1H], vecs[R_T1H] = s1h, t1h
    vecs[R_S2H], vecs[R_T2H] = s2h, t2h
    vecs[R_B4] = b4
    assert all(v.shape[0] <= 128 for v in vecs)
    rows = [jnp.pad(v.astype(jnp.float32), (0, 128 - v.shape[0])) for v in vecs]
    rows += [jnp.zeros((128,), jnp.float32)] * (_N_BN_ROWS - len(rows))
    p['bnv'] = jnp.stack(rows)
    return p


if __name__ == "__main__":
    B, seq_length, eeg_channels, num_classes = 2, 8, 5, 10

    key = jax.random.PRNGKey(0)
    k_x, k_p = jax.random.split(key)
    x = jax.random.normal(k_x, (B, seq_length, eeg_channels), dtype=jnp.float32)
    params = init_params(k_p, seq_length=seq_length, eeg_channels=eeg_channels,
                         num_classes=num_classes)

    log_probs, hx = parallel_conv_liquid_forward(x, params)
    log_probs = jax.block_until_ready(log_probs)
    hx = jax.block_until_ready(hx)

    assert log_probs.shape == (B, num_classes)
    assert hx.shape == (B, LIQUID_UNITS)
    assert bool(jnp.all(jnp.isfinite(log_probs)))
    assert bool(jnp.all(jnp.isfinite(hx)))
    # log-softmax rows should exp-sum to ~1
    assert bool(jnp.allclose(jnp.sum(jnp.exp(log_probs), axis=1), 1.0, atol=1e-3))

    print("KERNEL_OK")
</pallas_src>

<mosaic_0001>
module attributes {stable_mosaic.version = 11 : i64} {
  func.func @kernel(%arg0: i32, %arg1: memref<40x40xbf16, #tpu.memory_space<vmem>>, %arg2: memref<64x5xbf16, #tpu.memory_space<vmem>>, %arg3: memref<40x64xbf16, #tpu.memory_space<vmem>>, %arg4: memref<5x64x64xbf16, #tpu.memory_space<vmem>>, %arg5: memref<3x64x24xbf16, #tpu.memory_space<vmem>>, %arg6: memref<3x24x10xbf16, #tpu.memory_space<vmem>>, %arg7: memref<5x80xbf16, #tpu.memory_space<vmem>>, %arg8: memref<20x80xbf16, #tpu.memory_space<vmem>>, %arg9: memref<10x64xbf16, #tpu.memory_space<vmem>>, %arg10: memref<6x64xbf16, #tpu.memory_space<vmem>>, %arg11: memref<64x10xbf16, #tpu.memory_space<vmem>>, %arg12: memref<16x128xf32, #tpu.memory_space<vmem>>, %arg13: memref<8x128xf32, #tpu.memory_space<vmem>>, %arg14: memref<72x64xbf16, #tpu.memory_space<vmem>>, %arg15: memref<40x64xbf16, #tpu.memory_space<vmem>>) attributes {dimension_semantics = [#tpu.dimension_semantics<parallel>], iteration_bounds = array<i64: 2>, scalar_prefetch = 0 : i64, scratch_operands = 2 : i64, tpu.core_type = #tpu.core_type<tc>, window_params = [{transform_indices = @transform_0, window_bounds = array<i64: 40, 40>}, {transform_indices = @transform_1, window_bounds = array<i64: 64, 5>}, {pipeline_mode = #tpu.pipeline_mode<synchronous>, transform_indices = @transform_2, window_bounds = array<i64: 40, 64>}, {pipeline_mode = #tpu.pipeline_mode<synchronous>, transform_indices = @transform_3, window_bounds = array<i64: 5, 64, 64>}, {pipeline_mode = #tpu.pipeline_mode<synchronous>, transform_indices = @transform_4, window_bounds = array<i64: 3, 64, 24>}, {pipeline_mode = #tpu.pipeline_mode<synchronous>, transform_indices = @transform_5, window_bounds = array<i64: 3, 24, 10>}, {pipeline_mode = #tpu.pipeline_mode<synchronous>, transform_indices = @transform_6, window_bounds = array<i64: 5, 80>}, {pipeline_mode = #tpu.pipeline_mode<synchronous>, transform_indices = @transform_7, window_bounds = array<i64: 20, 80>}, {pipeline_mode = #tpu.pipeline_mode<synchronous>, transform_indices = @transform_8, window_bounds = array<i64: 10, 64>}, {pipeline_mode = #tpu.pipeline_mode<synchronous>, transform_indices = @transform_9, window_bounds = array<i64: 6, 64>}, {pipeline_mode = #tpu.pipeline_mode<synchronous>, transform_indices = @transform_10, window_bounds = array<i64: 64, 10>}, {pipeline_mode = #tpu.pipeline_mode<synchronous>, transform_indices = @transform_11, window_bounds = array<i64: 16, 128>}, {transform_indices = @transform_12, window_bounds = array<i64: 8, 128>}]} {
    %c0 = arith.constant 0 : index
    %c0_0 = arith.constant 0 : index
    %0 = vector.load %arg1[%c0, %c0_0] : memref<40x40xbf16, #tpu.memory_space<vmem>>, vector<40x40xbf16>
    %c0_1 = arith.constant 0 : index
    %c0_2 = arith.constant 0 : index
    %1 = vector.load %arg3[%c0_1, %c0_2] : memref<40x64xbf16, #tpu.memory_space<vmem>>, vector<40x64xbf16>
    %cst = arith.constant dense<0.000000e+00> : vector<40x64xf32>
    %2 = tpu.matmul %0, %1, %cst {dimension_numbers = #tpu.dot_dimension_numbers<[1], [0], [0], [1], [0, 0, 1, 1], [], []>} : vector<40x40xbf16>, vector<40x64xbf16>, vector<40x64xf32> -> vector<40x64xf32>
    %c0_3 = arith.constant 0 : index
    %c0_4 = arith.constant 0 : index
    %3 = vector.load %arg12[%c0_3, %c0_4] : memref<16x128xf32, #tpu.memory_space<vmem>>, vector<1x64xf32>
    %4 = vector.broadcast %3 : vector<1x64xf32> to vector<40x64xf32>
    %5 = arith.mulf %2, %4 : vector<40x64xf32>
    %c1 = arith.constant 1 : index
    %c0_5 = arith.constant 0 : index
    %6 = vector.load %arg12[%c1, %c0_5] : memref<16x128xf32, #tpu.memory_space<vmem>>, vector<1x64xf32>
    %7 = vector.broadcast %6 : vector<1x64xf32> to vector<40x64xf32>
    %8 = arith.addf %5, %7 : vector<40x64xf32>
    %cst_6 = arith.constant 0.000000e+00 : f32
    %9 = vector.broadcast %cst_6 : f32 to vector<40x64xf32>
    %10 = arith.maximumf %8, %9 : vector<40x64xf32>
    %cst_7 = arith.constant 0.000000e+00 : bf16
    %11 = vector.broadcast %cst_7 : bf16 to vector<16x64xbf16>
    %c0_8 = arith.constant 0 : index
    %c0_9 = arith.constant 0 : index
    %12 = vector.load %arg14[%c0_8, %c0_9] : memref<72x64xbf16, #tpu.memory_space<vmem>>, vector<16x64xbf16>
    tpu.vector_store %arg14[%c0_8, %c0_9], %11 {strides = array<i32>} : memref<72x64xbf16, #tpu.memory_space<vmem>>, vector<16x64xbf16>,
    %cst_10 = arith.constant 0.000000e+00 : bf16
    %13 = vector.broadcast %cst_10 : bf16 to vector<16x64xbf16>
    %c56 = arith.constant 56 : index
    %c0_11 = arith.constant 0 : index
    %14 = vector.load %arg14[%c56, %c0_11] : memref<72x64xbf16, #tpu.memory_space<vmem>>, vector<16x64xbf16>
    tpu.vector_store %arg14[%c56, %c0_11], %13 {strides = array<i32>} : memref<72x64xbf16, #tpu.memory_space<vmem>>, vector<16x64xbf16>,
    %15 = arith.truncf %10 : vector<40x64xf32> to vector<40x64xbf16>
    %c16 = arith.constant 16 : index
    %c0_12 = arith.constant 0 : index
    %16 = vector.load %arg14[%c16, %c0_12] : memref<72x64xbf16, #tpu.memory_space<vmem>>, vector<40x64xbf16>
    tpu.vector_store %arg14[%c16, %c0_12], %15 {strides = array<i32>} : memref<72x64xbf16, #tpu.memory_space<vmem>>, vector<40x64xbf16>,
    %cst_13 = arith.constant 0.000000e+00 : f32
    %17 = vector.broadcast %cst_13 : f32 to vector<40x64xf32>
    %c0_14 = arith.constant 0 : index
    %c0_15 = arith.constant 0 : index
    %18 = vector.load %arg14[%c0_14, %c0_15] : memref<72x64xbf16, #tpu.memory_space<vmem>>, vector<40x64xbf16>
    %c0_16 = arith.constant 0 : index
    %c0_17 = arith.constant 0 : index
    %c0_18 = arith.constant 0 : index
    %19 = vector.load %arg4[%c0_16, %c0_17, %c0_18] : memref<5x64x64xbf16, #tpu.memory_space<vmem>>, vector<1x64x64xbf16>
    %20 = vector.shape_cast %19 : vector<1x64x64xbf16> to vector<64x64xbf16>
    %cst_19 = arith.constant dense<0.000000e+00> : vector<40x64xf32>
    %21 = tpu.matmul %18, %20, %cst_19 {dimension_numbers = #tpu.dot_dimension_numbers<[1], [0], [0], [1], [0, 0, 1, 1], [], []>} : vector<40x64xbf16>, vector<64x64xbf16>, vector<40x64xf32> -> vector<40x64xf32>
    %22 = arith.addf %17, %21 : vector<40x64xf32>
    %c8 = arith.constant 8 : index
    %c0_20 = arith.constant 0 : index
    %23 = vector.load %arg14[%c8, %c0_20] : memref<72x64xbf16, #tpu.memory_space<vmem>>, vector<40x64xbf16>
    %c1_21 = arith.constant 1 : index
    %c0_22 = arith.constant 0 : index
    %c0_23 = arith.constant 0 : index
    %24 = vector.load %arg4[%c1_21, %c0_22, %c0_23] : memref<5x64x64xbf16, #tpu.memory_space<vmem>>, vector<1x64x64xbf16>
    %25 = vector.shape_cast %24 : vector<1x64x64xbf16> to vector<64x64xbf16>
    %cst_24 = arith.constant dense<0.000000e+00> : vector<40x64xf32>
    %26 = tpu.matmul %23, %25, %cst_24 {dimension_numbers = #tpu.dot_dimension_numbers<[1], [0], [0], [1], [0, 0, 1, 1], [], []>} : vector<40x64xbf16>, vector<64x64xbf16>, vector<40x64xf32> -> vector<40x64xf32>
    %27 = arith.addf %22, %26 : vector<40x64xf32>
    %c16_25 = arith.constant 16 : index
    %c0_26 = arith.constant 0 : index
    %28 = vector.load %arg14[%c16_25, %c0_26] : memref<72x64xbf16, #tpu.memory_space<vmem>>, vector<40x64xbf16>
    %c2 = arith.constant 2 : index
    %c0_27 = arith.constant 0 : index
    %c0_28 = arith.constant 0 : index
    %29 = vector.load %arg4[%c2, %c0_27, %c0_28] : memref<5x64x64xbf16, #tpu.memory_space<vmem>>, vector<1x64x64xbf16>
    %30 = vector.shape_cast %29 : vector<1x64x64xbf16> to vector<64x64xbf16>
    %cst_29 = arith.constant dense<0.000000e+00> : vector<40x64xf32>
    %31 = tpu.matmul %28, %30, %cst_29 {dimension_numbers = #tpu.dot_dimension_numbers<[1], [0], [0], [1], [0, 0, 1, 1], [], []>} : vector<40x64xbf16>, vector<64x64xbf16>, vector<40x64xf32> -> vector<40x64xf32>
    %32 = arith.addf %27, %31 : vector<40x64xf32>
    %c24 = arith.constant 24 : index
    %c0_30 = arith.constant 0 : index
    %33 = vector.load %arg14[%c24, %c0_30] : memref<72x64xbf16, #tpu.memory_space<vmem>>, vector<40x64xbf16>
    %c3 = arith.constant 3 : index
    %c0_31 = arith.constant 0 : index
    %c0_32 = arith.constant 0 : index
    %34 = vector.load %arg4[%c3, %c0_31, %c0_32] : memref<5x64x64xbf16, #tpu.memory_space<vmem>>, vector<1x64x64xbf16>
    %35 = vector.shape_cast %34 : vector<1x64x64xbf16> to vector<64x64xbf16>
    %cst_33 = arith.constant dense<0.000000e+00> : vector<40x64xf32>
    %36 = tpu.matmul %33, %35, %cst_33 {dimension_numbers = #tpu.dot_dimension_numbers<[1], [0], [0], [1], [0, 0, 1, 1], [], []>} : vector<40x64xbf16>, vector<64x64xbf16>, vector<40x64xf32> -> vector<40x64xf32>
    %37 = arith.addf %32, %36 : vector<40x64xf32>
    %c32 = arith.constant 32 : index
    %c0_34 = arith.constant 0 : index
    %38 = vector.load %arg14[%c32, %c0_34] : memref<72x64xbf16, #tpu.memory_space<vmem>>, vector<40x64xbf16>
    %c4 = arith.constant 4 : index
    %c0_35 = arith.constant 0 : index
    %c0_36 = arith.constant 0 : index
    %39 = vector.load %arg4[%c4, %c0_35, %c0_36] : memref<5x64x64xbf16, #tpu.memory_space<vmem>>, vector<1x64x64xbf16>
    %40 = vector.shape_cast %39 : vector<1x64x64xbf16> to vector<64x64xbf16>
    %cst_37 = arith.constant dense<0.000000e+00> : vector<40x64xf32>
    %41 = tpu.matmul %38, %40, %cst_37 {dimension_numbers = #tpu.dot_dimension_numbers<[1], [0], [0], [1], [0, 0, 1, 1], [], []>} : vector<40x64xbf16>, vector<64x64xbf16>, vector<40x64xf32> -> vector<40x64xf32>
    %42 = arith.addf %37, %41 : vector<40x64xf32>
    %c2_38 = arith.constant 2 : index
    %c0_39 = arith.constant 0 : index
    %43 = vector.load %arg12[%c2_38, %c0_39] : memref<16x128xf32, #tpu.memory_space<vmem>>, vector<1x64xf32>
    %44 = vector.broadcast %43 : vector<1x64xf32> to vector<40x64xf32>
    %45 = arith.mulf %42, %44 : vector<40x64xf32>
    %c3_40 = arith.constant 3 : index
    %c0_41 = arith.constant 0 : index
    %46 = vector.load %arg12[%c3_40, %c0_41] : memref<16x128xf32, #tpu.memory_space<vmem>>, vector<1x64xf32>
    %47 = vector.broadcast %46 : vector<1x64xf32> to vector<40x64xf32>
    %48 = arith.addf %45, %47 : vector<40x64xf32>
    %cst_42 = arith.constant 0.000000e+00 : f32
    %49 = vector.broadcast %cst_42 : f32 to vector<40x64xf32>
    %50 = arith.maximumf %48, %49 : vector<40x64xf32>
    %cst_43 = arith.constant 0xFF800000 : f32
    %51 = vector.broadcast %cst_43 : f32 to vector<16x64xf32>
    %52 = tpu.concatenate %51, %50, %51 in 0 : vector<16x64xf32>, vector<40x64xf32>, vector<16x64xf32> -> vector<72x64xf32>
    %53 = vector.extract_strided_slice %52 {offsets = [0, 0], sizes = [40, 64], strides = [1, 1]} : vector<72x64xf32> to vector<40x64xf32>
    %54 = vector.extract_strided_slice %52 {offsets = [8, 0], sizes = [40, 64], strides = [1, 1]} : vector<72x64xf32> to vector<40x64xf32>
    %55 = arith.maximumf %53, %54 : vector<40x64xf32>
    %56 = vector.extract_strided_slice %52 {offsets = [16, 0], sizes = [40, 64], strides = [1, 1]} : vector<72x64xf32> to vector<40x64xf32>
    %57 = arith.maximumf %55, %56 : vector<40x64xf32>
    %58 = vector.extract_strided_slice %52 {offsets = [24, 0], sizes = [40, 64], strides = [1, 1]} : vector<72x64xf32> to vector<40x64xf32>
    %59 = arith.maximumf %57, %58 : vector<40x64xf32>
    %60 = vector.extract_strided_slice %52 {offsets = [32, 0], sizes = [40, 64], strides = [1, 1]} : vector<72x64xf32> to vector<40x64xf32>
    %61 = arith.maximumf %59, %60 : vector<40x64xf32>
    %62 = vector.extract_strided_slice %61 {offsets = [0, 0], sizes = [8, 64], strides = [1, 1]} : vector<40x64xf32> to vector<8x64xf32>
    %63 = vector.extract_strided_slice %61 {offsets = [16, 0], sizes = [8, 64], strides = [1, 1]} : vector<40x64xf32> to vector<8x64xf32>
    %64 = vector.extract_strided_slice %61 {offsets = [32, 0], sizes = [8, 64], strides = [1, 1]} : vector<40x64xf32> to vector<8x64xf32>
    %65 = tpu.concatenate %62, %63, %64 in 0 : vector<8x64xf32>, vector<8x64xf32>, vector<8x64xf32> -> vector<24x64xf32>
    %cst_44 = arith.constant 0.000000e+00 : bf16
    %66 = vector.broadcast %cst_44 : bf16 to vector<8x64xbf16>
    %c0_45 = arith.constant 0 : index
    %c0_46 = arith.constant 0 : index
    %67 = vector.load %arg15[%c0_45, %c0_46] : memref<40x64xbf16, #tpu.memory_space<vmem>>, vector<8x64xbf16>
    tpu.vector_store %arg15[%c0_45, %c0_46], %66 {strides = array<i32>} : memref<40x64xbf16, #tpu.memory_space<vmem>>, vector<8x64xbf16>,
    %cst_47 = arith.constant 0.000000e+00 : bf16
    %68 = vector.broadcast %cst_47 : bf16 to vector<8x64xbf16>
    %c32_48 = arith.constant 32 : index
    %c0_49 = arith.constant 0 : index
    %69 = vector.load %arg15[%c32_48, %c0_49] : memref<40x64xbf16, #tpu.memory_space<vmem>>, vector<8x64xbf16>
    tpu.vector_store %arg15[%c32_48, %c0_49], %68 {strides = array<i32>} : memref<40x64xbf16, #tpu.memory_space<vmem>>, vector<8x64xbf16>,
    %70 = arith.truncf %65 : vector<24x64xf32> to vector<24x64xbf16>
    %c8_50 = arith.constant 8 : index
    %c0_51 = arith.constant 0 : index
    %71 = vector.load %arg15[%c8_50, %c0_51] : memref<40x64xbf16, #tpu.memory_space<vmem>>, vector<24x64xbf16>
    tpu.vector_store %arg15[%c8_50, %c0_51], %70 {strides = array<i32>} : memref<40x64xbf16, #tpu.memory_space<vmem>>, vector<24x64xbf16>,
    %cst_52 = arith.constant 0.000000e+00 : f32
    %72 = vector.broadcast %cst_52 : f32 to vector<24x24xf32>
    %c0_53 = arith.constant 0 : index
    %c0_54 = arith.constant 0 : index
    %73 = vector.load %arg15[%c0_53, %c0_54] : memref<40x64xbf16, #tpu.memory_space<vmem>>, vector<24x64xbf16>
    %c0_55 = arith.constant 0 : index
    %c0_56 = arith.constant 0 : index
    %c0_57 = arith.constant 0 : index
    %74 = vector.load %arg5[%c0_55, %c0_56, %c0_57] : memref<3x64x24xbf16, #tpu.memory_space<vmem>>, vector<1x64x24xbf16>
    %75 = vector.shape_cast %74 : vector<1x64x24xbf16> to vector<64x24xbf16>
    %cst_58 = arith.constant dense<0.000000e+00> : vector<24x24xf32>
    %76 = tpu.matmul %73, %75, %cst_58 {dimension_numbers = #tpu.dot_dimension_numbers<[1], [0], [0], [1], [0, 0, 1, 1], [], []>} : vector<24x64xbf16>, vector<64x24xbf16>, vector<24x24xf32> -> vector<24x24xf32>
    %77 = arith.addf %72, %76 : vector<24x24xf32>
    %c8_59 = arith.constant 8 : index
    %c0_60 = arith.constant 0 : index
    %78 = vector.load %arg15[%c8_59, %c0_60] : memref<40x64xbf16, #tpu.memory_space<vmem>>, vector<24x64xbf16>
    %c1_61 = arith.constant 1 : index
    %c0_62 = arith.constant 0 : index
    %c0_63 = arith.constant 0 : index
    %79 = vector.load %arg5[%c1_61, %c0_62, %c0_63] : memref<3x64x24xbf16, #tpu.memory_space<vmem>>, vector<1x64x24xbf16>
    %80 = vector.shape_cast %79 : vector<1x64x24xbf16> to vector<64x24xbf16>
    %cst_64 = arith.constant dense<0.000000e+00> : vector<24x24xf32>
    %81 = tpu.matmul %78, %80, %cst_64 {dimension_numbers = #tpu.dot_dimension_numbers<[1], [0], [0], [1], [0, 0, 1, 1], [], []>} : vector<24x64xbf16>, vector<64x24xbf16>, vector<24x24xf32> -> vector<24x24xf32>
    %82 = arith.addf %77, %81 : vector<24x24xf32>
    %c16_65 = arith.constant 16 : index
    %c0_66 = arith.constant 0 : index
    %83 = vector.load %arg15[%c16_65, %c0_66] : memref<40x64xbf16, #tpu.memory_space<vmem>>, vector<24x64xbf16>
    %c2_67 = arith.constant 2 : index
    %c0_68 = arith.constant 0 : index
    %c0_69 = arith.constant 0 : index
    %84 = vector.load %arg5[%c2_67, %c0_68, %c0_69] : memref<3x64x24xbf16, #tpu.memory_space<vmem>>, vector<1x64x24xbf16>
    %85 = vector.shape_cast %84 : vector<1x64x24xbf16> to vector<64x24xbf16>
    %cst_70 = arith.constant dense<0.000000e+00> : vector<24x24xf32>
    %86 = tpu.matmul %83, %85, %cst_70 {dimension_numbers = #tpu.dot_dimension_numbers<[1], [0], [0], [1], [0, 0, 1, 1], [], []>} : vector<24x64xbf16>, vector<64x24xbf16>, vector<24x24xf32> -> vector<24x24xf32>
    %87 = arith.addf %82, %86 : vector<24x24xf32>
    %c4_71 = arith.constant 4 : index
    %c0_72 = arith.constant 0 : index
    %88 = vector.load %arg12[%c4_71, %c0_72] : memref<16x128xf32, #tpu.memory_space<vmem>>, vector<1x24xf32>
    %89 = vector.broadcast %88 : vector<1x24xf32> to vector<24x24xf32>
    %90 = arith.mulf %87, %89 : vector<24x24xf32>
    %c5 = arith.constant 5 : index
    %c0_73 = arith.constant 0 : index
    %91 = vector.load %arg12[%c5, %c0_73] : memref<16x128xf32, #tpu.memory_space<vmem>>, vector<1x24xf32>
    %92 = vector.broadcast %91 : vector<1x24xf32> to vector<24x24xf32>
    %93 = arith.addf %90, %92 : vector<24x24xf32>
    %cst_74 = arith.constant 0.000000e+00 : f32
    %94 = vector.broadcast %cst_74 : f32 to vector<24x24xf32>
    %95 = arith.maximumf %93, %94 : vector<24x24xf32>
    %cst_75 = arith.constant 0.000000e+00 : f32
    %96 = vector.broadcast %cst_75 : f32 to vector<8x10xf32>
    %97 = vector.extract_strided_slice %95 {offsets = [0, 0], sizes = [8, 24], strides = [1, 1]} : vector<24x24xf32> to vector<8x24xf32>
    %98 = arith.truncf %97 : vector<8x24xf32> to vector<8x24xbf16>
    %c0_76 = arith.constant 0 : index
    %c0_77 = arith.constant 0 : index
    %c0_78 = arith.constant 0 : index
    %99 = vector.load %arg6[%c0_76, %c0_77, %c0_78] : memref<3x24x10xbf16, #tpu.memory_space<vmem>>, vector<1x24x10xbf16>
    %100 = vector.shape_cast %99 : vector<1x24x10xbf16> to vector<24x10xbf16>
    %cst_79 = arith.constant dense<0.000000e+00> : vector<8x10xf32>
    %101 = tpu.matmul %98, %100, %cst_79 {dimension_numbers = #tpu.dot_dimension_numbers<[1], [0], [0], [1], [0, 0, 1, 1], [], []>} : vector<8x24xbf16>, vector<24x10xbf16>, vector<8x10xf32> -> vector<8x10xf32>
    %102 = arith.addf %96, %101 : vector<8x10xf32>
    %103 = vector.extract_strided_slice %95 {offsets = [8, 0], sizes = [8, 24], strides = [1, 1]} : vector<24x24xf32> to vector<8x24xf32>
    %104 = arith.truncf %103 : vector<8x24xf32> to vector<8x24xbf16>
    %c1_80 = arith.constant 1 : index
    %c0_81 = arith.constant 0 : index
    %c0_82 = arith.constant 0 : index
    %105 = vector.load %arg6[%c1_80, %c0_81, %c0_82] : memref<3x24x10xbf16, #tpu.memory_space<vmem>>, vector<1x24x10xbf16>
    %106 = vector.shape_cast %105 : vector<1x24x10xbf16> to vector<24x10xbf16>
    %cst_83 = arith.constant dense<0.000000e+00> : vector<8x10xf32>
    %107 = tpu.matmul %104, %106, %cst_83 {dimension_numbers = #tpu.dot_dimension_numbers<[1], [0], [0], [1], [0, 0, 1, 1], [], []>} : vector<8x24xbf16>, vector<24x10xbf16>, vector<8x10xf32> -> vector<8x10xf32>
    %108 = arith.addf %102, %107 : vector<8x10xf32>
    %109 = vector.extract_strided_slice %95 {offsets = [16, 0], sizes = [8, 24], strides = [1, 1]} : vector<24x24xf32> to vector<8x24xf32>
    %110 = arith.truncf %109 : vector<8x24xf32> to vector<8x24xbf16>
    %c2_84 = arith.constant 2 : index
    %c0_85 = arith.constant 0 : index
    %c0_86 = arith.constant 0 : index
    %111 = vector.load %arg6[%c2_84, %c0_85, %c0_86] : memref<3x24x10xbf16, #tpu.memory_space<vmem>>, vector<1x24x10xbf16>
    %112 = vector.shape_cast %111 : vector<1x24x10xbf16> to vector<24x10xbf16>
    %cst_87 = arith.constant dense<0.000000e+00> : vector<8x10xf32>
    %113 = tpu.matmul %110, %112, %cst_87 {dimension_numbers = #tpu.dot_dimension_numbers<[1], [0], [0], [1], [0, 0, 1, 1], [], []>} : vector<8x24xbf16>, vector<24x10xbf16>, vector<8x10xf32> -> vector<8x10xf32>
    %114 = arith.addf %108, %113 : vector<8x10xf32>
    %c6 = arith.constant 6 : index
    %c0_88 = arith.constant 0 : index
    %115 = vector.load %arg12[%c6, %c0_88] : memref<16x128xf32, #tpu.memory_space<vmem>>, vector<1x10xf32>
    %116 = vector.broadcast %115 : vector<1x10xf32> to vector<8x10xf32>
    %117 = arith.mulf %114, %116 : vector<8x10xf32>
    %c7 = arith.constant 7 : index
    %c0_89 = arith.constant 0 : index
    %118 = vector.load %arg12[%c7, %c0_89] : memref<16x128xf32, #tpu.memory_space<vmem>>, vector<1x10xf32>
    %119 = vector.broadcast %118 : vector<1x10xf32> to vector<8x10xf32>
    %120 = arith.addf %117, %119 : vector<8x10xf32>
    %cst_90 = arith.constant 0.000000e+00 : f32
    %121 = vector.broadcast %cst_90 : f32 to vector<8x10xf32>
    %122 = arith.cmpf ogt, %120, %121 : vector<8x10xf32>
    %cst_91 = arith.constant 0.00999999977 : f32
    %123 = vector.broadcast %cst_91 : f32 to vector<8x10xf32>
    %124 = arith.mulf %123, %120 : vector<8x10xf32>
    %125 = arith.select %122, %120, %124 : vector<8x10xi1>, vector<8x10xf32>
    %c12 = arith.constant 12 : index
    %c0_92 = arith.constant 0 : index
    %126 = vector.load %arg12[%c12, %c0_92] : memref<16x128xf32, #tpu.memory_space<vmem>>, vector<1x80xf32>
    %c0_93 = arith.constant 0 : index
    %c0_94 = arith.constant 0 : index
    %127 = vector.load %arg2[%c0_93, %c0_94] : memref<64x5xbf16, #tpu.memory_space<vmem>>, vector<64x5xbf16>
    %c0_95 = arith.constant 0 : index
    %c0_96 = arith.constant 0 : index
    %128 = vector.load %arg7[%c0_95, %c0_96] : memref<5x80xbf16, #tpu.memory_space<vmem>>, vector<5x80xbf16>
    %cst_97 = arith.constant dense<0.000000e+00> : vector<64x80xf32>
    %129 = tpu.matmul %127, %128, %cst_97 {dimension_numbers = #tpu.dot_dimension_numbers<[1], [0], [0], [1], [0, 0, 1, 1], [], []>} : vector<64x5xbf16>, vector<5x80xbf16>, vector<64x80xf32> -> vector<64x80xf32>
    %130 = vector.broadcast %126 : vector<1x80xf32> to vector<64x80xf32>
    %131 = arith.addf %129, %130 : vector<64x80xf32>
    %c0_98 = arith.constant 0 : index
    %c0_99 = arith.constant 0 : index
    %132 = vector.load %arg8[%c0_98, %c0_99] : memref<20x80xbf16, #tpu.memory_space<vmem>>, vector<20x80xbf16>
    %cst_100 = arith.constant 0.000000e+00 : f32
    %133 = vector.broadcast %cst_100 : f32 to vector<8x20xf32>
    %134 = vector.extract_strided_slice %131 {offsets = [0, 0], sizes = [8, 80], strides = [1, 1]} : vector<64x80xf32> to vector<8x80xf32>
    %135 = arith.truncf %133 : vector<8x20xf32> to vector<8x20xbf16>
    %cst_101 = arith.constant dense<0.000000e+00> : vector<8x80xf32>
    %136 = tpu.matmul %135, %132, %cst_101 {dimension_numbers = #tpu.dot_dimension_numbers<[1], [0], [0], [1], [0, 0, 1, 1], [], []>} : vector<8x20xbf16>, vector<20x80xbf16>, vector<8x80xf32> -> vector<8x80xf32>
    %137 = arith.addf %134, %136 : vector<8x80xf32>
    %138 = vector.extract_strided_slice %137 {offsets = [0, 0], sizes = [8, 20], strides = [1, 1]} : vector<8x80xf32> to vector<8x20xf32>
    %139 = math.tanh %138 : vector<8x20xf32>
    %140 = vector.extract_strided_slice %137 {offsets = [0, 20], sizes = [8, 20], strides = [1, 1]} : vector<8x80xf32> to vector<8x20xf32>
    %141 = math.tanh %140 : vector<8x20xf32>
    %142 = vector.extract_strided_slice %137 {offsets = [0, 40], sizes = [8, 20], strides = [1, 1]} : vector<8x80xf32> to vector<8x20xf32>
    %143 = vector.extract_strided_slice %137 {offsets = [0, 60], sizes = [8, 20], strides = [1, 1]} : vector<8x80xf32> to vector<8x20xf32>
    %144 = arith.addf %142, %143 : vector<8x20xf32>
    %145 = arith.negf %144 : vector<8x20xf32>
    %146 = math.exp %145 : vector<8x20xf32>
    %cst_102 = arith.constant 1.000000e+00 : f32
    %147 = vector.broadcast %cst_102 : f32 to vector<8x20xf32>
    %148 = arith.addf %147, %146 : vector<8x20xf32>
    %149 = arith.divf %147, %148 : vector<8x20xf32>
    %cst_103 = arith.constant 1.000000e+00 : f32
    %150 = vector.broadcast %cst_103 : f32 to vector<8x20xf32>
    %151 = arith.subf %150, %149 : vector<8x20xf32>
    %152 = arith.mulf %139, %151 : vector<8x20xf32>
    %153 = arith.mulf %149, %141 : vector<8x20xf32>
    %154 = arith.addf %152, %153 : vector<8x20xf32>
    %155 = vector.extract_strided_slice %131 {offsets = [8, 0], sizes = [8, 80], strides = [1, 1]} : vector<64x80xf32> to vector<8x80xf32>
    %156 = arith.truncf %154 : vector<8x20xf32> to vector<8x20xbf16>
    %cst_104 = arith.constant dense<0.000000e+00> : vector<8x80xf32>
    %157 = tpu.matmul %156, %132, %cst_104 {dimension_numbers = #tpu.dot_dimension_numbers<[1], [0], [0], [1], [0, 0, 1, 1], [], []>} : vector<8x20xbf16>, vector<20x80xbf16>, vector<8x80xf32> -> vector<8x80xf32>
    %158 = arith.addf %155, %157 : vector<8x80xf32>
    %159 = vector.extract_strided_slice %158 {offsets = [0, 0], sizes = [8, 20], strides = [1, 1]} : vector<8x80xf32> to vector<8x20xf32>
    %160 = math.tanh %159 : vector<8x20xf32>
    %161 = vector.extract_strided_slice %158 {offsets = [0, 20], sizes = [8, 20], strides = [1, 1]} : vector<8x80xf32> to vector<8x20xf32>
    %162 = math.tanh %161 : vector<8x20xf32>
    %163 = vector.extract_strided_slice %158 {offsets = [0, 40], sizes = [8, 20], strides = [1, 1]} : vector<8x80xf32> to vector<8x20xf32>
    %164 = vector.extract_strided_slice %158 {offsets = [0, 60], sizes = [8, 20], strides = [1, 1]} : vector<8x80xf32> to vector<8x20xf32>
    %165 = arith.addf %163, %164 : vector<8x20xf32>
    %166 = arith.negf %165 : vector<8x20xf32>
    %167 = math.exp %166 : vector<8x20xf32>
    %cst_105 = arith.constant 1.000000e+00 : f32
    %168 = vector.broadcast %cst_105 : f32 to vector<8x20xf32>
    %169 = arith.addf %168, %167 : vector<8x20xf32>
    %170 = arith.divf %168, %169 : vector<8x20xf32>
    %cst_106 = arith.constant 1.000000e+00 : f32
    %171 = vector.broadcast %cst_106 : f32 to vector<8x20xf32>
    %172 = arith.subf %171, %170 : vector<8x20xf32>
    %173 = arith.mulf %160, %172 : vector<8x20xf32>
    %174 = arith.mulf %170, %162 : vector<8x20xf32>
    %175 = arith.addf %173, %174 : vector<8x20xf32>
    %176 = vector.extract_strided_slice %131 {offsets = [16, 0], sizes = [8, 80], strides = [1, 1]} : vector<64x80xf32> to vector<8x80xf32>
    %177 = arith.truncf %175 : vector<8x20xf32> to vector<8x20xbf16>
    %cst_107 = arith.constant dense<0.000000e+00> : vector<8x80xf32>
    %178 = tpu.matmul %177, %132, %cst_107 {dimension_numbers = #tpu.dot_dimension_numbers<[1], [0], [0], [1], [0, 0, 1, 1], [], []>} : vector<8x20xbf16>, vector<20x80xbf16>, vector<8x80xf32> -> vector<8x80xf32>
    %179 = arith.addf %176, %178 : vector<8x80xf32>
    %180 = vector.extract_strided_slice %179 {offsets = [0, 0], sizes = [8, 20], strides = [1, 1]} : vector<8x80xf32> to vector<8x20xf32>
    %181 = math.tanh %180 : vector<8x20xf32>
    %182 = vector.extract_strided_slice %179 {offsets = [0, 20], sizes = [8, 20], strides = [1, 1]} : vector<8x80xf32> to vector<8x20xf32>
    %183 = math.tanh %182 : vector<8x20xf32>
    %184 = vector.extract_strided_slice %179 {offsets = [0, 40], sizes = [8, 20], strides = [1, 1]} : vector<8x80xf32> to vector<8x20xf32>
    %185 = vector.extract_strided_slice %179 {offsets = [0, 60], sizes = [8, 20], strides = [1, 1]} : vector<8x80xf32> to vector<8x20xf32>
    %186 = arith.addf %184, %185 : vector<8x20xf32>
    %187 = arith.negf %186 : vector<8x20xf32>
    %188 = math.exp %187 : vector<8x20xf32>
    %cst_108 = arith.constant 1.000000e+00 : f32
    %189 = vector.broadcast %cst_108 : f32 to vector<8x20xf32>
    %190 = arith.addf %189, %188 : vector<8x20xf32>
    %191 = arith.divf %189, %190 : vector<8x20xf32>
    %cst_109 = arith.constant 1.000000e+00 : f32
    %192 = vector.broadcast %cst_109 : f32 to vector<8x20xf32>
    %193 = arith.subf %192, %191 : vector<8x20xf32>
    %194 = arith.mulf %181, %193 : vector<8x20xf32>
    %195 = arith.mulf %191, %183 : vector<8x20xf32>
    %196 = arith.addf %194, %195 : vector<8x20xf32>
    %197 = vector.extract_strided_slice %131 {offsets = [24, 0], sizes = [8, 80], strides = [1, 1]} : vector<64x80xf32> to vector<8x80xf32>
    %198 = arith.truncf %196 : vector<8x20xf32> to vector<8x20xbf16>
    %cst_110 = arith.constant dense<0.000000e+00> : vector<8x80xf32>
    %199 = tpu.matmul %198, %132, %cst_110 {dimension_numbers = #tpu.dot_dimension_numbers<[1], [0], [0], [1], [0, 0, 1, 1], [], []>} : vector<8x20xbf16>, vector<20x80xbf16>, vector<8x80xf32> -> vector<8x80xf32>
    %200 = arith.addf %197, %199 : vector<8x80xf32>
    %201 = vector.extract_strided_slice %200 {offsets = [0, 0], sizes = [8, 20], strides = [1, 1]} : vector<8x80xf32> to vector<8x20xf32>
    %202 = math.tanh %201 : vector<8x20xf32>
    %203 = vector.extract_strided_slice %200 {offsets = [0, 20], sizes = [8, 20], strides = [1, 1]} : vector<8x80xf32> to vector<8x20xf32>
    %204 = math.tanh %203 : vector<8x20xf32>
    %205 = vector.extract_strided_slice %200 {offsets = [0, 40], sizes = [8, 20], strides = [1, 1]} : vector<8x80xf32> to vector<8x20xf32>
    %206 = vector.extract_strided_slice %200 {offsets = [0, 60], sizes = [8, 20], strides = [1, 1]} : vector<8x80xf32> to vector<8x20xf32>
    %207 = arith.addf %205, %206 : vector<8x20xf32>
    %208 = arith.negf %207 : vector<8x20xf32>
    %209 = math.exp %208 : vector<8x20xf32>
    %cst_111 = arith.constant 1.000000e+00 : f32
    %210 = vector.broadcast %cst_111 : f32 to vector<8x20xf32>
    %211 = arith.addf %210, %209 : vector<8x20xf32>
    %212 = arith.divf %210, %211 : vector<8x20xf32>
    %cst_112 = arith.constant 1.000000e+00 : f32
    %213 = vector.broadcast %cst_112 : f32 to vector<8x20xf32>
    %214 = arith.subf %213, %212 : vector<8x20xf32>
    %215 = arith.mulf %202, %214 : vector<8x20xf32>
    %216 = arith.mulf %212, %204 : vector<8x20xf32>
    %217 = arith.addf %215, %216 : vector<8x20xf32>
    %218 = vector.extract_strided_slice %131 {offsets = [32, 0], sizes = [8, 80], strides = [1, 1]} : vector<64x80xf32> to vector<8x80xf32>
    %219 = arith.truncf %217 : vector<8x20xf32> to vector<8x20xbf16>
    %cst_113 = arith.constant dense<0.000000e+00> : vector<8x80xf32>
    %220 = tpu.matmul %219, %132, %cst_113 {dimension_numbers = #tpu.dot_dimension_numbers<[1], [0], [0], [1], [0, 0, 1, 1], [], []>} : vector<8x20xbf16>, vector<20x80xbf16>, vector<8x80xf32> -> vector<8x80xf32>
    %221 = arith.addf %218, %220 : vector<8x80xf32>
    %222 = vector.extract_strided_slice %221 {offsets = [0, 0], sizes = [8, 20], strides = [1, 1]} : vector<8x80xf32> to vector<8x20xf32>
    %223 = math.tanh %222 : vector<8x20xf32>
    %224 = vector.extract_strided_slice %221 {offsets = [0, 20], sizes = [8, 20], strides = [1, 1]} : vector<8x80xf32> to vector<8x20xf32>
    %225 = math.tanh %224 : vector<8x20xf32>
    %226 = vector.extract_strided_slice %221 {offsets = [0, 40], sizes = [8, 20], strides = [1, 1]} : vector<8x80xf32> to vector<8x20xf32>
    %227 = vector.extract_strided_slice %221 {offsets = [0, 60], sizes = [8, 20], strides = [1, 1]} : vector<8x80xf32> to vector<8x20xf32>
    %228 = arith.addf %226, %227 : vector<8x20xf32>
    %229 = arith.negf %228 : vector<8x20xf32>
    %230 = math.exp %229 : vector<8x20xf32>
    %cst_114 = arith.constant 1.000000e+00 : f32
    %231 = vector.broadcast %cst_114 : f32 to vector<8x20xf32>
    %232 = arith.addf %231, %230 : vector<8x20xf32>
    %233 = arith.divf %231, %232 : vector<8x20xf32>
    %cst_115 = arith.constant 1.000000e+00 : f32
    %234 = vector.broadcast %cst_115 : f32 to vector<8x20xf32>
    %235 = arith.subf %234, %233 : vector<8x20xf32>
    %236 = arith.mulf %223, %235 : vector<8x20xf32>
    %237 = arith.mulf %233, %225 : vector<8x20xf32>
    %238 = arith.addf %236, %237 : vector<8x20xf32>
    %239 = vector.extract_strided_slice %131 {offsets = [40, 0], sizes = [8, 80], strides = [1, 1]} : vector<64x80xf32> to vector<8x80xf32>
    %240 = arith.truncf %238 : vector<8x20xf32> to vector<8x20xbf16>
    %cst_116 = arith.constant dense<0.000000e+00> : vector<8x80xf32>
    %241 = tpu.matmul %240, %132, %cst_116 {dimension_numbers = #tpu.dot_dimension_numbers<[1], [0], [0], [1], [0, 0, 1, 1], [], []>} : vector<8x20xbf16>, vector<20x80xbf16>, vector<8x80xf32> -> vector<8x80xf32>
    %242 = arith.addf %239, %241 : vector<8x80xf32>
    %243 = vector.extract_strided_slice %242 {offsets = [0, 0], sizes = [8, 20], strides = [1, 1]} : vector<8x80xf32> to vector<8x20xf32>
    %244 = math.tanh %243 : vector<8x20xf32>
    %245 = vector.extract_strided_slice %242 {offsets = [0, 20], sizes = [8, 20], strides = [1, 1]} : vector<8x80xf32> to vector<8x20xf32>
    %246 = math.tanh %245 : vector<8x20xf32>
    %247 = vector.extract_strided_slice %242 {offsets = [0, 40], sizes = [8, 20], strides = [1, 1]} : vector<8x80xf32> to vector<8x20xf32>
    %248 = vector.extract_strided_slice %242 {offsets = [0, 60], sizes = [8, 20], strides = [1, 1]} : vector<8x80xf32> to vector<8x20xf32>
    %249 = arith.addf %247, %248 : vector<8x20xf32>
    %250 = arith.negf %249 : vector<8x20xf32>
    %251 = math.exp %250 : vector<8x20xf32>
    %cst_117 = arith.constant 1.000000e+00 : f32
    %252 = vector.broadcast %cst_117 : f32 to vector<8x20xf32>
    %253 = arith.addf %252, %251 : vector<8x20xf32>
    %254 = arith.divf %252, %253 : vector<8x20xf32>
    %cst_118 = arith.constant 1.000000e+00 : f32
    %255 = vector.broadcast %cst_118 : f32 to vector<8x20xf32>
    %256 = arith.subf %255, %254 : vector<8x20xf32>
    %257 = arith.mulf %244, %256 : vector<8x20xf32>
    %258 = arith.mulf %254, %246 : vector<8x20xf32>
    %259 = arith.addf %257, %258 : vector<8x20xf32>
    %260 = vector.extract_strided_slice %131 {offsets = [48, 0], sizes = [8, 80], strides = [1, 1]} : vector<64x80xf32> to vector<8x80xf32>
    %261 = arith.truncf %259 : vector<8x20xf32> to vector<8x20xbf16>
    %cst_119 = arith.constant dense<0.000000e+00> : vector<8x80xf32>
    %262 = tpu.matmul %261, %132, %cst_119 {dimension_numbers = #tpu.dot_dimension_numbers<[1], [0], [0], [1], [0, 0, 1, 1], [], []>} : vector<8x20xbf16>, vector<20x80xbf16>, vector<8x80xf32> -> vector<8x80xf32>
    %263 = arith.addf %260, %262 : vector<8x80xf32>
    %264 = vector.extract_strided_slice %263 {offsets = [0, 0], sizes = [8, 20], strides = [1, 1]} : vector<8x80xf32> to vector<8x20xf32>
    %265 = math.tanh %264 : vector<8x20xf32>
    %266 = vector.extract_strided_slice %263 {offsets = [0, 20], sizes = [8, 20], strides = [1, 1]} : vector<8x80xf32> to vector<8x20xf32>
    %267 = math.tanh %266 : vector<8x20xf32>
    %268 = vector.extract_strided_slice %263 {offsets = [0, 40], sizes = [8, 20], strides = [1, 1]} : vector<8x80xf32> to vector<8x20xf32>
    %269 = vector.extract_strided_slice %263 {offsets = [0, 60], sizes = [8, 20], strides = [1, 1]} : vector<8x80xf32> to vector<8x20xf32>
    %270 = arith.addf %268, %269 : vector<8x20xf32>
    %271 = arith.negf %270 : vector<8x20xf32>
    %272 = math.exp %271 : vector<8x20xf32>
    %cst_120 = arith.constant 1.000000e+00 : f32
    %273 = vector.broadcast %cst_120 : f32 to vector<8x20xf32>
    %274 = arith.addf %273, %272 : vector<8x20xf32>
    %275 = arith.divf %273, %274 : vector<8x20xf32>
    %cst_121 = arith.constant 1.000000e+00 : f32
    %276 = vector.broadcast %cst_121 : f32 to vector<8x20xf32>
    %277 = arith.subf %276, %275 : vector<8x20xf32>
    %278 = arith.mulf %265, %277 : vector<8x20xf32>
    %279 = arith.mulf %275, %267 : vector<8x20xf32>
    %280 = arith.addf %278, %279 : vector<8x20xf32>
    %281 = vector.extract_strided_slice %131 {offsets = [56, 0], sizes = [8, 80], strides = [1, 1]} : vector<64x80xf32> to vector<8x80xf32>
    %282 = arith.truncf %280 : vector<8x20xf32> to vector<8x20xbf16>
    %cst_122 = arith.constant dense<0.000000e+00> : vector<8x80xf32>
    %283 = tpu.matmul %282, %132, %cst_122 {dimension_numbers = #tpu.dot_dimension_numbers<[1], [0], [0], [1], [0, 0, 1, 1], [], []>} : vector<8x20xbf16>, vector<20x80xbf16>, vector<8x80xf32> -> vector<8x80xf32>
    %284 = arith.addf %281, %283 : vector<8x80xf32>
    %285 = vector.extract_strided_slice %284 {offsets = [0, 0], sizes = [8, 20], strides = [1, 1]} : vector<8x80xf32> to vector<8x20xf32>
    %286 = math.tanh %285 : vector<8x20xf32>
    %287 = vector.extract_strided_slice %284 {offsets = [0, 20], sizes = [8, 20], strides = [1, 1]} : vector<8x80xf32> to vector<8x20xf32>
    %288 = math.tanh %287 : vector<8x20xf32>
    %289 = vector.extract_strided_slice %284 {offsets = [0, 40], sizes = [8, 20], strides = [1, 1]} : vector<8x80xf32> to vector<8x20xf32>
    %290 = vector.extract_strided_slice %284 {offsets = [0, 60], sizes = [8, 20], strides = [1, 1]} : vector<8x80xf32> to vector<8x20xf32>
    %291 = arith.addf %289, %290 : vector<8x20xf32>
    %292 = arith.negf %291 : vector<8x20xf32>
    %293 = math.exp %292 : vector<8x20xf32>
    %cst_123 = arith.constant 1.000000e+00 : f32
    %294 = vector.broadcast %cst_123 : f32 to vector<8x20xf32>
    %295 = arith.addf %294, %293 : vector<8x20xf32>
    %296 = arith.divf %294, %295 : vector<8x20xf32>
    %cst_124 = arith.constant 1.000000e+00 : f32
    %297 = vector.broadcast %cst_124 : f32 to vector<8x20xf32>
    %298 = arith.subf %297, %296 : vector<8x20xf32>
    %299 = arith.mulf %286, %298 : vector<8x20xf32>
    %300 = arith.mulf %296, %288 : vector<8x20xf32>
    %301 = arith.addf %299, %300 : vector<8x20xf32>
    %302 = vector.extract_strided_slice %301 {offsets = [0, 14], sizes = [8, 6], strides = [1, 1]} : vector<8x20xf32> to vector<8x6xf32>
    %303 = arith.truncf %125 : vector<8x10xf32> to vector<8x10xbf16>
    %c0_125 = arith.constant 0 : index
    %c0_126 = arith.constant 0 : index
    %304 = vector.load %arg9[%c0_125, %c0_126] : memref<10x64xbf16, #tpu.memory_space<vmem>>, vector<10x64xbf16>
    %cst_127 = arith.constant dense<0.000000e+00> : vector<8x64xf32>
    %305 = tpu.matmul %303, %304, %cst_127 {dimension_numbers = #tpu.dot_dimension_numbers<[1], [0], [0], [1], [0, 0, 1, 1], [], []>} : vector<8x10xbf16>, vector<10x64xbf16>, vector<8x64xf32> -> vector<8x64xf32>
    %306 = arith.truncf %302 : vector<8x6xf32> to vector<8x6xbf16>
    %c0_128 = arith.constant 0 : index
    %c0_129 = arith.constant 0 : index
    %307 = vector.load %arg10[%c0_128, %c0_129] : memref<6x64xbf16, #tpu.memory_space<vmem>>, vector<6x64xbf16>
    %cst_130 = arith.constant dense<0.000000e+00> : vector<8x64xf32>
    %308 = tpu.matmul %306, %307, %cst_130 {dimension_numbers = #tpu.dot_dimension_numbers<[1], [0], [0], [1], [0, 0, 1, 1], [], []>} : vector<8x6xbf16>, vector<6x64xbf16>, vector<8x64xf32> -> vector<8x64xf32>
    %309 = arith.addf %305, %308 : vector<8x64xf32>
    %c8_131 = arith.constant 8 : index
    %c0_132 = arith.constant 0 : index
    %310 = vector.load %arg12[%c8_131, %c0_132] : memref<16x128xf32, #tpu.memory_space<vmem>>, vector<1x64xf32>
    %311 = vector.broadcast %310 : vector<1x64xf32> to vector<8x64xf32>
    %312 = arith.mulf %309, %311 : vector<8x64xf32>
    %c9 = arith.constant 9 : index
    %c0_133 = arith.constant 0 : index
    %313 = vector.load %arg12[%c9, %c0_133] : memref<16x128xf32, #tpu.memory_space<vmem>>, vector<1x64xf32>
    %314 = vector.broadcast %313 : vector<1x64xf32> to vector<8x64xf32>
    %315 = arith.addf %312, %314 : vector<8x64xf32>
    %cst_134 = arith.constant 0.000000e+00 : f32
    %316 = vector.broadcast %cst_134 : f32 to vector<8x64xf32>
    %317 = arith.cmpf ogt, %315, %316 : vector<8x64xf32>
    %cst_135 = arith.constant 0.00999999977 : f32
    %318 = vector.broadcast %cst_135 : f32 to vector<8x64xf32>
    %319 = arith.mulf %318, %315 : vector<8x64xf32>
    %320 = arith.select %317, %315, %319 : vector<8x64xi1>, vector<8x64xf32>
    %321 = arith.truncf %320 : vector<8x64xf32> to vector<8x64xbf16>
    %c0_136 = arith.constant 0 : index
    %c0_137 = arith.constant 0 : index
    %322 = vector.load %arg11[%c0_136, %c0_137] : memref<64x10xbf16, #tpu.memory_space<vmem>>, vector<64x10xbf16>
    %cst_138 = arith.constant dense<0.000000e+00> : vector<8x10xf32>
    %323 = tpu.matmul %321, %322, %cst_138 {dimension_numbers = #tpu.dot_dimension_numbers<[1], [0], [0], [1], [0, 0, 1, 1], [], []>} : vector<8x64xbf16>, vector<64x10xbf16>, vector<8x10xf32> -> vector<8x10xf32>
    %c10 = arith.constant 10 : index
    %c0_139 = arith.constant 0 : index
    %324 = vector.load %arg12[%c10, %c0_139] : memref<16x128xf32, #tpu.memory_space<vmem>>, vector<1x10xf32>
    %325 = vector.broadcast %324 : vector<1x10xf32> to vector<8x10xf32>
    %326 = arith.mulf %323, %325 : vector<8x10xf32>
    %c11 = arith.constant 11 : index
    %c0_140 = arith.constant 0 : index
    %327 = vector.load %arg12[%c11, %c0_140] : memref<16x128xf32, #tpu.memory_space<vmem>>, vector<1x10xf32>
    %328 = vector.broadcast %327 : vector<1x10xf32> to vector<8x10xf32>
    %329 = arith.addf %326, %328 : vector<8x10xf32>
    %cst_141 = arith.constant 0.000000e+00 : f32
    %330 = vector.broadcast %cst_141 : f32 to vector<8x10xf32>
    %331 = arith.cmpf ogt, %329, %330 : vector<8x10xf32>
    %cst_142 = arith.constant 0.00999999977 : f32
    %332 = vector.broadcast %cst_142 : f32 to vector<8x10xf32>
    %333 = arith.mulf %332, %329 : vector<8x10xf32>
    %334 = arith.select %331, %329, %333 : vector<8x10xi1>, vector<8x10xf32>
    %cst_143 = arith.constant dense<0xFF800000> : vector<8xf32>
    %335 = vector.multi_reduction <maximumf>, %334, %cst_143 [1] : vector<8x10xf32> to vector<8xf32>
    %336 = vector.shape_cast %335 : vector<8xf32> to vector<8x1xf32>
    %337 = vector.broadcast %336 : vector<8x1xf32> to vector<8x10xf32>
    %338 = arith.subf %334, %337 : vector<8x10xf32>
    %339 = math.exp %338 : vector<8x10xf32>
    %cst_144 = arith.constant dense<0.000000e+00> : vector<8xf32>
    %340 = vector.multi_reduction <add>, %339, %cst_144 [1] : vector<8x10xf32> to vector<8xf32>
    %341 = vector.shape_cast %340 : vector<8xf32> to vector<8x1xf32>
    %342 = math.log %341 : vector<8x1xf32>
    %343 = arith.addf %342, %336 : vector<8x1xf32>
    %344 = vector.broadcast %343 : vector<8x1xf32> to vector<8x10xf32>
    %345 = arith.subf %334, %344 : vector<8x10xf32>
    %c0_145 = arith.constant 0 : index
    %c0_146 = arith.constant 0 : index
    %346 = vector.load %arg13[%c0_145, %c0_146] : memref<8x128xf32, #tpu.memory_space<vmem>>, vector<8x10xf32>
    tpu.vector_store %arg13[%c0_145, %c0_146], %345 {strides = array<i32>} : memref<8x128xf32, #tpu.memory_space<vmem>>, vector<8x10xf32>,
    %c0_147 = arith.constant 0 : index
    %c10_148 = arith.constant 10 : index
    %347 = vector.load %arg13[%c0_147, %c10_148] : memref<8x128xf32, #tpu.memory_space<vmem>>, vector<8x20xf32>
    tpu.vector_store %arg13[%c0_147, %c10_148], %301 {strides = array<i32>} : memref<8x128xf32, #tpu.memory_space<vmem>>, vector<8x20xf32>,
    return
  }
  func.func @transform_0(%arg0: i32) -> (i32, i32) {
    %c0_i32 = arith.constant 0 : i32
    %c0_i32_0 = arith.constant 0 : i32
    return %arg0, %c0_i32 : i32, i32
  }
  func.func @transform_1(%arg0: i32) -> (i32, i32) {
    %c0_i32 = arith.constant 0 : i32
    %c0_i32_0 = arith.constant 0 : i32
    return %arg0, %c0_i32 : i32, i32
  }
  func.func @transform_2(%arg0: i32) -> (i32, i32) {
    %c0_i32 = arith.constant 0 : i32
    %c0_i32_0 = arith.constant 0 : i32
    %c0_i32_1 = arith.constant 0 : i32
    return %c0_i32, %c0_i32_0 : i32, i32
  }
  func.func @transform_3(%arg0: i32) -> (i32, i32, i32) {
    %c0_i32 = arith.constant 0 : i32
    %c0_i32_0 = arith.constant 0 : i32
    %c0_i32_1 = arith.constant 0 : i32
    %c0_i32_2 = arith.constant 0 : i32
    return %c0_i32, %c0_i32_0, %c0_i32_1 : i32, i32, i32
  }
  func.func @transform_4(%arg0: i32) -> (i32, i32, i32) {
    %c0_i32 = arith.constant 0 : i32
    %c0_i32_0 = arith.constant 0 : i32
    %c0_i32_1 = arith.constant 0 : i32
    %c0_i32_2 = arith.constant 0 : i32
    return %c0_i32, %c0_i32_0, %c0_i32_1 : i32, i32, i32
  }
  func.func @transform_5(%arg0: i32) -> (i32, i32, i32) {
    %c0_i32 = arith.constant 0 : i32
    %c0_i32_0 = arith.constant 0 : i32
    %c0_i32_1 = arith.constant 0 : i32
    %c0_i32_2 = arith.constant 0 : i32
    return %c0_i32, %c0_i32_0, %c0_i32_1 : i32, i32, i32
  }
  func.func @transform_6(%arg0: i32) -> (i32, i32) {
    %c0_i32 = arith.constant 0 : i32
    %c0_i32_0 = arith.constant 0 : i32
    %c0_i32_1 = arith.constant 0 : i32
    return %c0_i32, %c0_i32_0 : i32, i32
  }
  func.func @transform_7(%arg0: i32) -> (i32, i32) {
    %c0_i32 = arith.constant 0 : i32
    %c0_i32_0 = arith.constant 0 : i32
    %c0_i32_1 = arith.constant 0 : i32
    return %c0_i32, %c0_i32_0 : i32, i32
  }
  func.func @transform_8(%arg0: i32) -> (i32, i32) {
    %c0_i32 = arith.constant 0 : i32
    %c0_i32_0 = arith.constant 0 : i32
    %c0_i32_1 = arith.constant 0 : i32
    return %c0_i32, %c0_i32_0 : i32, i32
  }
  func.func @transform_9(%arg0: i32) -> (i32, i32) {
    %c0_i32 = arith.constant 0 : i32
    %c0_i32_0 = arith.constant 0 : i32
    %c0_i32_1 = arith.constant 0 : i32
    return %c0_i32, %c0_i32_0 : i32, i32
  }
  func.func @transform_10(%arg0: i32) -> (i32, i32) {
    %c0_i32 = arith.constant 0 : i32
    %c0_i32_0 = arith.constant 0 : i32
    %c0_i32_1 = arith.constant 0 : i32
    return %c0_i32, %c0_i32_0 : i32, i32
  }
  func.func @transform_11(%arg0: i32) -> (i32, i32) {
    %c0_i32 = arith.constant 0 : i32
    %c0_i32_0 = arith.constant 0 : i32
    %c0_i32_1 = arith.constant 0 : i32
    return %c0_i32, %c0_i32_0 : i32, i32
  }
  func.func @transform_12(%arg0: i32) -> (i32, i32) {
    %c0_i32 = arith.constant 0 : i32
    %c0_i32_0 = arith.constant 0 : i32
    return %arg0, %c0_i32 : i32, i32
  }
}

</mosaic_0001>

<bundles_post_ra>
// kernel: parallel_conv_liquid_forward.1
= control target key start
LH: loop header
LB: loop body
LE: loop exit
PB: predicated region body
PF: predicated region fallthrough
CT: control target
= control target key end

     0   :  { %s2666_s21 = smov 0   ;;  %s3025_s0 = inlined_call_operand.vmem [shape: bf16[80,40], index: 0, kind: input, shape index: {}]   ;;  %s3026_s1 = inlined_call_operand.vmem [shape: bf16[128,5], index: 1, kind: input, shape index: {}]   ;;  %s3027_s2 = inlined_call_operand.vmem [shape: bf16[40,64], index: 2, kind: input, shape index: {}]   ;;  %s3028_s3 = inlined_call_operand.vmem [shape: bf16[5,64,64], index: 3, kind: input, shape index: {}]   ;;  %s3029_s4 = inlined_call_operand.vmem [shape: bf16[3,64,24], index: 4, kind: input, shape index: {}]   ;;  %s3030_s5 = inlined_call_operand.vmem [shape: bf16[3,24,10], index: 5, kind: input, shape index: {}]   ;;  %s3031_s6 = inlined_call_operand.vmem [shape: bf16[5,80], index: 6, kind: input, shape index: {}]   ;;  %s3032_s7 = inlined_call_operand.vmem [shape: bf16[20,80], index: 7, kind: input, shape index: {}]   ;;  %s3033_s8 = inlined_call_operand.vmem [shape: bf16[10,64], index: 8, kind: input, shape index: {}]   ;;  %s3034_s9 = inlined_call_operand.vmem [shape: bf16[6,64], index: 9, kind: input, shape index: {}]   ;;  %s3035_s10 = inlined_call_operand.vmem [shape: bf16[64,10], index: 10, kind: input, shape index: {}]   ;;  %s3036_s11 = inlined_call_operand.vmem [shape: f32[16,128], index: 11, kind: input, shape index: {}]   ;;  %s3037_s12 = inlined_call_operand.vmem [shape: f32[16,128], index: 12, kind: output, shape index: {}]  }
   0x1 LB: > { %s2672_s22 = sadd.s32 4294967295, %s2592_s21   ;;  %p2096_p0 = scmp.ge.s32.totalorder %s2592_s21, 1  ;;  %s2592_s21 = sphi %s2666_s21, %s22_s21  }
   0x2   : > { %p374_p1 = scmp.lt.s32.totalorder %s2592_s21, 3 }
   0x4   : > { %p375_p2 = pnand %p2096_p0, %p374_p1 }
   0x5   : > { %s420_s25 = smul.u32 (!%p375_p2), 5, %s2672_s22  ;;  %s2098_s14 = sshll.u32 (!%p375_p2), %s2672_s22, 3 }
   0x6   : > { %378 = sbr.rel (%p375_p2) target bundleno = 4356 (0x1104), region = 68  ;;  %p427_p4 = scmp.lt.s32.totalorder (!%p375_p2), %s2098_s14, 15 }
   0x7   : > { %p421_p3 = scmp.lt.s32.totalorder (!%p375_p2), %s420_s25, 9  ;;  %s2596_s23 = smov (!%p375_p2), 108  }
   0x8   : > { %s2597_s24 = smov (!%p375_p2), 20   ;;  %s2600_s19 = smov (!%p375_p2), 10  }
   0x9   : > { %p432_p5 = scmp.lt.s32.totalorder (!%p375_p2), %s2672_s22, 1 }
   0xb   : > { %v446_v0 = vld [vmem:[%s3027_s2 + $0x10] sm:$0xf]  ;;  %vm485_vm0 = vcmask 1043456   ;;  %s3039_s25 = smov (!%p421_p3, %s420_s25), 9  ;;  %v2433_v4 = vld [vmem:[%s3027_s2 + $0x8] sm:$0xff]  ;;  %v2432_v5 = vld [vmem:[%s3027_s2] sm:$0xff] }
   0xc   : > { %v469_v1 = vunpack.c.l.b16 %v446_v0  ;;  %s2097_s28 = sshll.u32 %s3039_s25, 2  ;;  %vm475_vm1 = vcmask 326656   ;;  %v2437_v7 = vld [vmem:[%s3028_s3 + $0x18] sm:$0xff]  ;;  %v2436_v8 = vld [vmem:[%s3028_s3 + $0x10] sm:$0xff]  ;;  %vm531_vm2 = vcmask 519168   ;;  %v2435_v13 = vld [vmem:[%s3028_s3 + $0x8] sm:$0xff] }
   0xd   : > { %s424_s15 = scalar_lea.vmem %s3025_s0, %s2097_s28  ;;  %681 = vmatpush.bf16.msra.mxu2 %v2437_v7  ;;  %v2441_v14 = vld [vmem:[%s3028_s3 + $0x38] sm:$0xff]  ;;  %v2594_v15 = vmov 0   ;;  %v2434_v16 = vld [vmem:[%s3028_s3] sm:$0xff]  ;;  %v2440_v17 = vld [vmem:[%s3028_s3 + $0x30] sm:$0xff]  ;;  %vm606_vm3 = vcmask 523264   ;;  %vm1363_vm4 = vcmask 1041408  }
   0xe   : > { %v472_v2 = vpack.c.b16 %v469_v1, %v469_v1  ;;  %v2430_v6 = vld [vmem:[%s424_s15] sm:$0xff]  ;;  %v2431_v9 = vld [vmem:[%s424_s15 + $0x8] sm:$0xff]  ;;  %v441_v10 = vld [vmem:[%s424_s15 + $0x10] sm:$0xf]  ;;  %532 = vst.msk [vmem:[#allocation2] sm:$0xf] %vm531_vm2, %v2594_v15  ;;  %620 = vmatpush.bf16.msra.mxu1 %v2441_v14 }
   0xf   : > { %v456_v11 = vunpack.c.l.b16 %v441_v10  ;;  %533 = vst.msk [vmem:[#allocation2 + $0x4] sm:$0xf] %vm531_vm2, %v2594_v15  ;;  %v2439_v19 = vld [vmem:[%s3028_s3 + $0x28] sm:$0xff]  ;;  %v2447_v20 = vld [vmem:[%s3028_s3 + $0x58] sm:$0xff]  ;;  %v2438_v21 = vld [vmem:[%s3028_s3 + $0x20] sm:$0xff]  ;;  %vm1364_vm5 = vcmask 1042432  }
  0x10   : > { %v487_v3 = vsel %vm485_vm0, %v472_v2, 0  ;;  %534 = vst.msk [vmem:[#allocation2 + $0x1c] sm:$0xf] %vm531_vm2, %v2594_v15  ;;  %764 = vmatpush.bf16.msra.mxu3 %v2447_v20  ;;  %v2446_v22 = vld [vmem:[%s3028_s3 + $0x50] sm:$0xff]  ;;  %v2453_v23 = vld [vmem:[%s3028_s3 + $0x78] sm:$0xff]  ;;  %v2445_v24 = vld [vmem:[%s3028_s3 + $0x48] sm:$0xff] }
  0x11   : > { %494 = vmatpush.bf16.msra.mxu0 %v487_v3  ;;  %682 = vmatpush.bf16.msra.mxu2 %v2436_v8  ;;  %v459_v12 = vpack.c.b16 %v456_v11, %v456_v11  ;;  %535 = vst.msk [vmem:[#allocation2 + $0x20] sm:$0xf] %vm531_vm2, %v2594_v15  ;;  %v2444_v25 = vld [vmem:[%s3028_s3 + $0x40] sm:$0xff]  ;;  %v2452_v26 = vld [vmem:[%s3028_s3 + $0x70] sm:$0xff]  ;;  %v2459_v27 = vld [vmem:[%s3028_s3 + $0x98] sm:$0xff]  ;;  %vm1228_vm6 = vcmask 195584  }
  0x12   : > { %989 = vst.msk [vmem:[#allocation3] sm:$0xf] %vm531_vm2, %v2594_v15  ;;  %621 = vmatpush.bf16.msra.mxu1 %v2440_v17  ;;  %v2451_v28 = vld [vmem:[%s3028_s3 + $0x68] sm:$0xff]  ;;  %v2521_v29 = vld [vmem:[%s3036_s11] ss:$0 sm:$0xff]  ;;  %v2458_v39 = vld [vmem:[%s3028_s3 + $0x90] sm:$0xff] }
  0x13   : > { %990 = vst.msk [vmem:[#allocation3 + $0x10] sm:$0xf] %vm531_vm2, %v2594_v15  ;;  %v2450_v30 = vld [vmem:[%s3028_s3 + $0x60] sm:$0xff]  ;;  %v2457_v42 = vld [vmem:[%s3028_s3 + $0x88] sm:$0xff]  ;;  %s3041_s14 = smov (!%p427_p4, %s2098_s14), 15  ;;  %vm1350_vm7 = vcmask 39936  }
  0x14   : > { %765 = vmatpush.bf16.msra.mxu3 %v2446_v22  ;;  %v2522_v31 = vld [vmem:[%s3036_s11 + $0x1] ss:$0 sm:$0xff]  ;;  %s2099_s15 = sshll.u32 %s3041_s14, 2  ;;  %s2598_s25 = smov 88   ;;  %vm1411_vm12 = vcmask 162816  }
  0x15   : > { %495 = vmatpush.bf16.msra.mxu0 %v2433_v4  ;;  %683 = vmatpush.bf16.msra.mxu2 %v2435_v13  ;;  %v2456_v56 = vld [vmem:[%s3028_s3 + $0x80] sm:$0xff]  ;;  %s2898_s18 = scalar_lea.vmem %s3026_s1, %s2099_s15  ;;  %s3043_s22 = smov (!%p432_p5, %s2672_s22), 1 }
  0x16   : > { %v2487_v18 = vld [vmem:[#allocation2] sm:$0xff]   ;;  %622 = vmatpush.bf16.msra.mxu1 %v2439_v19  ;;  %s2100_s20 = sshll.u32 %s3043_s22, 3 }
  0x18   : > { %766 = vmatpush.bf16.msra.mxu3 %v2445_v24 }
  0x19   : > { %496 = vmatpush.bf16.msra.mxu0 %v2432_v5  ;;  %684 = vmatpush.bf16.msra.mxu2 %v2434_v16 }
  0x1a   : > { %623 = vmatpush.bf16.msra.mxu1 %v2438_v21 }
  0x1c   : > { %2117 = vmatmul.msk.bf16.vlgmr.msra.gmra.mxu0 %vm475_vm1, %v2430_v6  ;;  %2163 = vmatmul.msk.bf16.vlgmr.msra.gmra.mxu2 %vm606_vm3, %v2487_v18  ;;  %v880_v18 = vld [vmem:[#allocation2 + $0x20] sm:$0xf] }
  0x1d   : > { %852 = vmatpush.bf16.msrb.mxu0 %v2453_v23  ;;  %767 = vmatpush.bf16.msra.mxu3 %v2444_v25  ;;  %v899_v19 = vunpack.c.l.b16 %v880_v18 }
  0x1e   : > { %940 = vmatpush.bf16.msrb.mxu1 %v2459_v27 }
  0x1f   : > { %v902_v20 = vpack.c.b16 %v899_v19, %v899_v19 }
  0x21   : > { %853 = vmatpush.bf16.msrb.mxu0 %v2452_v26 }
  0x22   : > { %941 = vmatpush.bf16.msrb.mxu1 %v2458_v39 }
  0x25   : > { %854 = vmatpush.bf16.msrb.mxu0 %v2451_v28 }
  0x26   : > { %942 = vmatpush.bf16.msrb.mxu1 %v2457_v42  ;;  %v2463_v42 = vld [vmem:[%s3029_s4 + $0x18] sm:$0xff] }
  0x27   : > { %1112 = vmatpush.bf16.msrb.mxu3 %v2463_v42 }
  0x29   : > { %855 = vmatpush.bf16.msrb.mxu0 %v2450_v30 }
  0x2a   : > { %943 = vmatpush.bf16.msrb.mxu1 %v2456_v56 }
  0x2c   : > { %2118 = vmatmul.msk.bf16.gmra.mxu0 %vm475_vm1, %v2431_v9 }
  0x3c   : > { %2119 = vmatmul.msk.bf16.gmra.mxu0 %vm475_vm1, %v459_v12 }
  0x99   : > { %v498_v32 = vpop.f32.mrf.mxu0 }
  0x9a   : > { %v514_v33 = vmul.f32 %v2521_v29, %v498_v32 }
  0x9c   : > { %v521_v34 = vadd.f32 %v2522_v31, %v514_v33 }
  0x9e   : > { %v526_v35 = vmax.f32 %v521_v34, 0.0 }
  0x9f   : > { %v686_v21 = vpop.f32.mrf.mxu2 }
  0xa0   : > { %v536_v36 = vpack.c.bf16 %v526_v35, %v526_v35 }
  0xa1   : > { %v500_v37 = vpop.f32.mrf.mxu0 }
  0xa2   : > { %541 = vst.msk [vmem:[#allocation2 + $0x8] sm:$0xf] %vm531_vm2, %v536_v36  ;;  %v515_v38 = vmul.f32 %v2521_v29, %v500_v37 }
  0xa4   : > { %v522_v40 = vadd.f32 %v2522_v31, %v515_v38 }
  0xa6   : > { %v527_v41 = vmax.f32 %v522_v40, 0.0  ;;  %v2467_v40 = vld [vmem:[%s3029_s4 + $0x38] sm:$0xff] }
  0xa7   : > { %v688_v22 = vpop.f32.mrf.mxu2  ;;  %1060 = vmatpush.bf16.msrb.mxu2 %v2467_v40 }
  0xa8   : > { %v537_v43 = vpack.c.bf16 %v527_v41, %v527_v41 }
  0xa9   : > { %v503_v44 = vpop.f32.mrf.mxu0  ;;  %v2505_v45 = vld [vmem:[#allocation2 + $0x4] sm:$0xff]  }
  0xaa   : > { %542 = vst.msk [vmem:[#allocation2 + $0xc] sm:$0xf] %vm531_vm2, %v537_v43  ;;  %v516_v46 = vmul.f32 %v2521_v29, %v503_v44  ;;  %2144 = vmatmul.msk.bf16.vlgmr.msra.gmra.mxu1 %vm606_vm3, %v2505_v45  ;;  %v2462_v45 = vld [vmem:[%s3029_s4 + $0x10] sm:$0xff] }
  0xab   : > { %1113 = vmatpush.bf16.msrb.mxu3 %v2462_v45 }
  0xac   : > { %v523_v47 = vadd.f32 %v2522_v31, %v516_v46 }
  0xae   : > { %v528_v48 = vmax.f32 %v523_v47, 0.0  ;;  %v2461_v47 = vld [vmem:[%s3029_s4 + $0x8] sm:$0xff] }
  0xaf   : > { %1114 = vmatpush.bf16.msrb.mxu3 %v2461_v47 }
  0xb0   : > { %v538_v49 = vpack.c.bf16 %v528_v48, %v528_v48  ;;  %v2466_v48 = vld [vmem:[%s3029_s4 + $0x30] sm:$0xff] }
  0xb1   : > { %v505_v50 = vpop.f32.mrf.mxu0  ;;  %v2498_v51 = vld [vmem:[#allocation2 + $0x8] sm:$0xff]   ;;  %1061 = vmatpush.bf16.msrb.mxu2 %v2466_v48 }
  0xb2   : > { %v2442_v52 = vld [vmem:[#allocation2 + $0x8] sm:$0xff]  ;;  %543 = vst.msk [vmem:[#allocation2 + $0x10] sm:$0xf] %vm531_vm2, %v538_v49  ;;  %v517_v53 = vmul.f32 %v2521_v29, %v505_v50  ;;  %2164 = vmatmul.msk.bf16.gmra.mxu2 %vm606_vm3, %v2498_v51  ;;  %v2493_v3 = vunpack.c.h.b16 %v2498_v51 }
  0xb3   : > { %2198 = vmatmul.msk.bf16.vlgmr.msra.gmra.mxu3 %vm606_vm3, %v2442_v52 }
  0xb4   : > { %v524_v54 = vadd.f32 %v2522_v31, %v517_v53  ;;  %v2460_v53 = vld [vmem:[%s3029_s4] sm:$0xff] }
  0xb5   : > { %1115 = vmatpush.bf16.msrb.mxu3 %v2460_v53 }
  0xb6   : > { %v529_v55 = vmax.f32 %v524_v54, 0.0 }
  0xb8   : > { %v539_v57 = vpack.c.bf16 %v529_v55, %v529_v55 }
  0xb9   : > { %v508_v58 = vpop.f32.mrf.mxu0  ;;  %v2448_v59 = vld [vmem:[#allocation2 + $0xc] sm:$0xff] }
  0xba   : > { %544 = vst.msk [vmem:[#allocation2 + $0x14] sm:$0xf] %vm531_vm2, %v539_v57  ;;  %v518_v60 = vmul.f32 %v2521_v29, %v508_v58  ;;  %2233 = vmatmul.msk.bf16.vlgmr.msrb.gmra.mxu0 %vm606_vm3, %v2448_v59 }
  0xbc   : > { %v525_v61 = vadd.f32 %v2522_v31, %v518_v60 }
  0xbe   : > { %v530_v62 = vmax.f32 %v525_v61, 0.0  ;;  %v2523_v61 = vld [vmem:[%s3036_s11 + $0x2] ss:$0 sm:$0xff] }
  0xc0   : > { %v540_v63 = vpack.c.bf16 %v530_v62, %v530_v62 }
  0xc1   : > { %v550_v0 = vld [vmem:[#allocation2 + $0x10] sm:$0xff]   ;;  %v510_v2 = vpop.f32.mrf.mxu0 }
  0xc2   : > { %v2443_v1 = vld [vmem:[#allocation2 + $0x10] sm:$0xff]  ;;  %545 = vst.msk [vmem:[#allocation2 + $0x18] sm:$0xf] %vm531_vm2, %v540_v63  ;;  %v577_v4 = vunpack.c.l.b16 %v550_v0  ;;  %v578_v11 = vunpack.c.h.b16 %v550_v0  ;;  %v2524_v2 = vld [vmem:[%s3036_s11 + $0x3] ss:$0 sm:$0xff] }
  0xc3   : > { %2199 = vmatmul.msk.bf16.gmra.mxu3 %vm606_vm3, %v2443_v1  ;;  %v2454_v16 = vld [vmem:[#allocation2 + $0x10] sm:$0xff] }
  0xc4   : > { %v580_v5 = vpack.c.b16 %v577_v4, %v2493_v3  ;;  %v643_v6 = vpack.c.b16 %v577_v4, %v577_v4  ;;  %v581_v13 = vpack.c.b16 %v578_v11, %v578_v11  ;;  %v2465_v3 = vld [vmem:[%s3029_s4 + $0x28] sm:$0xff] }
  0xc5   : > { %1062 = vmatpush.bf16.msrb.mxu2 %v2465_v3 }
  0xc6   : > { %2145 = vmatmul.msk.bf16.gmra.mxu1 %vm606_vm3, %v580_v5  ;;  %2165 = vmatmul.msk.bf16.gmra.mxu2 %vm606_vm3, %v643_v6 }
  0xc9   : > { %v2449_v7 = vld [vmem:[#allocation2 + $0x14] sm:$0xff] }
  0xca   : > { %v704_v8 = vld [vmem:[#allocation2 + $0x18] sm:$0xff]   ;;  %2234 = vmatmul.msk.bf16.gmra.mxu0 %vm606_vm3, %v2449_v7 }
  0xcb   : > { %v723_v9 = vunpack.c.l.b16 %v704_v8  ;;  %v811_v12 = vunpack.c.h.b16 %v704_v8  ;;  %v2455_v17 = vld [vmem:[#allocation2 + $0x18] sm:$0xff] }
  0xcd   : > { %v726_v10 = vpack.c.b16 %v723_v9, %v723_v9  ;;  %v814_v14 = vpack.c.b16 %v811_v12, %v811_v12 }
  0xd3   : > { %2200 = vmatmul.msk.bf16.gmra.mxu3 %vm606_vm3, %v726_v10 }
  0xd6   : > { %2146 = vmatmul.msk.bf16.gmra.mxu1 %vm606_vm3, %v581_v13 }
  0xda   : > { %2235 = vmatmul.msk.bf16.gmra.mxu0 %vm606_vm3, %v814_v14 }
  0xe6   : > { %2268 = vmatmul.msk.bf16.vlgmr.msrb.gmra.mxu1 %vm606_vm3, %v2454_v16  ;;  %v2464_v16 = vld [vmem:[%s3029_s4 + $0x20] sm:$0xff] }
  0xe7   : > { %1063 = vmatpush.bf16.msrb.mxu2 %v2464_v16  ;;  %v1401_v16 = vld [vmem:[%s3032_s7 + $0x8] sm:$0x3] }
  0xf6   : > { %2269 = vmatmul.msk.bf16.gmra.mxu1 %vm606_vm3, %v2455_v17 }
 0x106   : > { %2270 = vmatmul.msk.bf16.gmra.mxu1 %vm606_vm3, %v902_v20 }
 0x127   : > { %v625_v23 = vpop.f32.mrf.mxu1 }
 0x128   : > { %v687_v51 = vadd.f32 %v686_v21, %v625_v23 }
 0x12f   : > { %v627_v27 = vpop.f32.mrf.mxu1 }
 0x130   : > { %v689_v52 = vadd.f32 %v688_v22, %v627_v27 }
 0x135   : > { %v691_v25 = vpop.f32.mrf.mxu2 }
 0x136   : > { %v769_v24 = vpop.f32.mrf.mxu3 }
 0x137   : > { %v857_v26 = vpop.f32.mrf.mxu0  ;;  %v783_v54 = vadd.f32 %v769_v24, %v687_v51  ;;  %v2472_v24 = vld [vmem:[%s3029_s4 + $0x58] sm:$0xff] }
 0x138   : > { %1180 = vmatpush.bf16.msra.mxu2 %v2472_v24 }
 0x139   : > { %v871_v56 = vadd.f32 %v857_v26, %v783_v54 }
 0x13d   : > { %v693_v30 = vpop.f32.mrf.mxu2 }
 0x13e   : > { %v771_v28 = vpop.f32.mrf.mxu3 }
 0x13f   : > { %v859_v29 = vpop.f32.mrf.mxu0  ;;  %v784_v55 = vadd.f32 %v771_v28, %v689_v52  ;;  %v2471_v28 = vld [vmem:[%s3029_s4 + $0x50] sm:$0xff] }
 0x140   : > { %1181 = vmatpush.bf16.msra.mxu2 %v2471_v28 }
 0x141   : > { %v872_v58 = vadd.f32 %v859_v29, %v784_v55  ;;  %v1128_v55 = vld [vmem:[#allocation3 + $0x10] sm:$0xf] }
 0x143   : > { %v630_v31 = vpop.f32.mrf.mxu1 }
 0x144   : > { %v692_v57 = vadd.f32 %v691_v25, %v630_v31 }
 0x146   : > { %v774_v32 = vpop.f32.mrf.mxu3 }
 0x147   : > { %v862_v33 = vpop.f32.mrf.mxu0  ;;  %v785_v63 = vadd.f32 %v774_v32, %v692_v57 }
 0x149   : > { %v696_v34 = vpop.f32.mrf.mxu2  ;;  %v873_v5 = vadd.f32 %v862_v33, %v785_v63  ;;  %v2347_v63 = vld [vmem:[%s3030_s5 + $0x14] sm:$0xf] }
 0x14b   : > { %v632_v35 = vpop.f32.mrf.mxu1 }
 0x14c   : > { %v694_v4 = vadd.f32 %v693_v30, %v632_v35 }
 0x14e   : > { %v776_v36 = vpop.f32.mrf.mxu3 }
 0x14f   : > { %v864_v37 = vpop.f32.mrf.mxu0  ;;  %v786_v10 = vadd.f32 %v776_v36, %v694_v4 }
 0x151   : > { %v698_v38 = vpop.f32.mrf.mxu2  ;;  %v874_v18 = vadd.f32 %v864_v37, %v786_v10  ;;  %v2360_v10 = vld [vmem:[%s3030_s5 + $0x20] sm:$0xf] }
 0x153   : > { %v635_v39 = vpop.f32.mrf.mxu1 }
 0x154   : > { %v697_v17 = vadd.f32 %v696_v34, %v635_v39 }
 0x156   : > { %v779_v41 = vpop.f32.mrf.mxu3 }
 0x157   : > { %v867_v43 = vpop.f32.mrf.mxu0  ;;  %v787_v25 = vadd.f32 %v779_v41, %v697_v17  ;;  %v2475_v17 = vld [vmem:[%s3030_s5 + $0x18] sm:$0xff] }
 0x159   : > { %v875_v29 = vadd.f32 %v867_v43, %v787_v25  ;;  %v2470_v43 = vld [vmem:[%s3029_s4 + $0x48] sm:$0xff] }
 0x15a   : > { %1182 = vmatpush.bf16.msra.mxu2 %v2470_v43 }
 0x15b   : > { %v637_v44 = vpop.f32.mrf.mxu1 }
 0x15e   : > { %v781_v46 = vpop.f32.mrf.mxu3 }
 0x15f   : > { %v869_v49 = vpop.f32.mrf.mxu0  ;;  %v2469_v46 = vld [vmem:[%s3029_s4 + $0x40] sm:$0xff] }
 0x160   : > { %1183 = vmatpush.bf16.msra.mxu2 %v2469_v46 }
 0x163   : > { %v945_v50 = vpop.f32.mrf.mxu1 }
 0x164   : > { %v959_v60 = vadd.f32 %v945_v50, %v871_v56  ;;  %v1143_v56 = vunpack.c.l.b16 %v1128_v55 }
 0x166   : > { %v966_v1 = vmul.f32 %v2523_v61, %v959_v60  ;;  %v1145_v57 = vpack.c.b16 %v1143_v56, %v1143_v56 }
 0x168   : > { %v973_v8 = vadd.f32 %v2524_v2, %v966_v1 }
 0x16a   : > { %v978_v13 = vmax.f32 %v973_v8, 0.0 }
 0x16b   : > { %v947_v59 = vpop.f32.mrf.mxu1 }
 0x16c   : > { %v960_v62 = vadd.f32 %v947_v59, %v872_v58  ;;  %v1213_v58 = vld [vmem:[%s3030_s5 + $0x8] sm:$0xf] }
 0x16d   : > { %v1253_v59 = vunpack.c.l.b16 %v1213_v58 }
 0x16e   : > { %v967_v0 = vmul.f32 %v2523_v61, %v960_v62 }
 0x16f   : > { %v1255_v60 = vpack.c.b16 %v1253_v59, %v1253_v59 }
 0x170   : > { %v974_v6 = vadd.f32 %v2524_v2, %v967_v0  ;;  %v1224_v0 = vunpack.c.l.b16 %v2347_v63 }
 0x171   : > { %v1261_v62 = vsel %vm485_vm0, %v1255_v60, 0 }
 0x172   : > { %v979_v11 = vmax.f32 %v974_v6, 0.0  ;;  %1269 = vmatpush.bf16.msra.mxu0 %v1261_v62  ;;  %v1226_v1 = vpack.c.b16 %v1224_v0, %v1224_v0  ;;  %v2473_v6 = vld [vmem:[%s3030_s5] sm:$0xff]  ;;  %v2911_v62 = vld [vmem:[%s3036_s11 + $0xc] ss:$0 sm:$0xff] }
 0x173   : > { %v950_v7 = vpop.f32.mrf.mxu1 }
 0x174   : > { %v961_v9 = vadd.f32 %v950_v7, %v873_v5  ;;  %v983_v19 = vmax.f32 %v978_v13, %v979_v11  ;;  %v1286_v11 = vunpack.c.l.b16 %v2360_v10 }
 0x176   : > { %v968_v12 = vmul.f32 %v2523_v61, %v961_v9  ;;  %1270 = vmatpush.bf16.msra.mxu0 %v2473_v6  ;;  %v2474_v9 = vld [vmem:[%s3030_s5 + $0xc] sm:$0xff]  ;;  %v1288_v13 = vpack.c.b16 %v1286_v11, %v1286_v11 }
 0x178   : > { %v975_v14 = vadd.f32 %v2524_v2, %v968_v12 }
 0x17a   : > { %v980_v20 = vmax.f32 %v975_v14, 0.0  ;;  %v1294_v14 = vsel %vm485_vm0, %v1288_v13, 0 }
 0x17b   : > { %v952_v21 = vpop.f32.mrf.mxu1  ;;  %1302 = vmatpush.bf16.msra.mxu1 %v1294_v14 }
 0x17c   : > { %v985_v22 = vmax.f32 %v983_v19, %v980_v20  ;;  %v962_v23 = vadd.f32 %v952_v21, %v874_v18  ;;  %v1407_v18 = vunpack.c.l.b16 %v1401_v16 }
 0x17e   : > { %v991_v26 = vpack.c.bf16 %v985_v22, %v985_v22  ;;  %v969_v27 = vmul.f32 %v2523_v61, %v962_v23  ;;  %v1409_v21 = vpack.c.b16 %v1407_v18, %v1407_v18 }
 0x17f   : > { %1303 = vmatpush.bf16.msra.mxu1 %v2475_v17 }
 0x180   : > { %994 = vst.msk [vmem:[#allocation3 + $0x4] sm:$0xf] %vm531_vm2, %v991_v26  ;;  %v976_v30 = vadd.f32 %v2524_v2, %v969_v27  ;;  %v2867_v25 = vsel %vm1363_vm4, %v1409_v21, 0  ;;  %v2873_v27 = vld [vmem:[%s3032_s7] sm:$0xff] }
 0x181   : > { %1424 = vmatpush.bf16.msrb.mxu0 %v2867_v25 }
 0x182   : > { %v981_v33 = vmax.f32 %v976_v30, 0.0 }
 0x183   : > { %v955_v31 = vpop.f32.mrf.mxu1  ;;  %1483 = vmatpush.bf16.msrb.mxu1 %v2867_v25 }
 0x184   : > { %v963_v32 = vadd.f32 %v955_v31, %v875_v29  ;;  %v984_v37 = vmax.f32 %v980_v20, %v981_v33  ;;  %v987_v38 = vmax.f32 %v985_v22, %v981_v33  ;;  %v1328_v20 = vld [vmem:[%s3031_s6] sm:$0x7]  ;;  %v2595_v22 = vmov 65535   ;;  %v2525_v29 = vld [vmem:[%s3036_s11 + $0x4] ss:$0 sm:$0xff] }
 0x185   : > { %v1365_v23 = vsel %vm1363_vm4, 4294967295, %v2595_v22  ;;  %1425 = vmatpush.bf16.msrb.mxu0 %v2873_v27 }
 0x186   : > { %v970_v34 = vmul.f32 %v2523_v61, %v963_v32  ;;  %v1366_v24 = vsel %vm1364_vm5, %v1365_v23, 0  ;;  %v2526_v32 = vld [vmem:[%s3036_s11 + $0x5] ss:$0 sm:$0xff] }
 0x187   : > { %v2495_v35 = vld [vmem:[#allocation3] sm:$0xff]   ;;  %v1368_v26 = vand.u32 %v1366_v24, %v1328_v20  ;;  %1484 = vmatpush.bf16.msrb.mxu1 %v2873_v27 }
 0x188   : > { %v977_v36 = vadd.f32 %v2524_v2, %v970_v34  ;;  %2313 = vmatmul.msk.bf16.vlgmr.msrb.gmra.mxu3 %vm606_vm3, %v2495_v35  ;;  %v2497_v48 = vunpack.c.h.b16 %v2495_v35  ;;  %v1233_v2 = vsel %vm485_vm0, %v1226_v1, 0 }
 0x189   : > { %1241 = vmatpush.bf16.msra.mxu3 %v1233_v2 }
 0x18a   : > { %v982_v39 = vmax.f32 %v977_v36, 0.0 }
 0x18b   : > { %v957_v40 = vpop.f32.mrf.mxu1 }
 0x18c   : > { %v986_v41 = vmax.f32 %v984_v37, %v982_v39  ;;  %v988_v42 = vmax.f32 %v987_v38, %v982_v39 }
 0x18d   : > { %1242 = vmatpush.bf16.msra.mxu3 %v2474_v9 }
 0x18e   : > { %v992_v44 = vpack.c.bf16 %v988_v42, %v988_v42  ;;  %v993_v45 = vpack.c.bf16 %v986_v41, %v986_v41 }
 0x190   : > { %995 = vst.msk [vmem:[#allocation3 + $0x8] sm:$0xf] %vm531_vm2, %v992_v44 }
 0x191   : > { %996 = vst.msk [vmem:[#allocation3 + $0xc] sm:$0xf] %vm531_vm2, %v993_v45  ;;  %1377 = vmatpush.bf16.msrb.mxu3 %v1368_v26 }
 0x198   : > { %v999_v47 = vld [vmem:[#allocation3 + $0x8] sm:$0xff]  }
 0x199   : > { %v1022_v49 = vunpack.c.l.b16 %v999_v47  ;;  %v1023_v52 = vunpack.c.h.b16 %v999_v47  ;;  %v2468_v54 = vld [vmem:[#allocation3 + $0x8] sm:$0xff] }
 0x19b   : > { %v1024_v50 = vpack.c.b16 %v1022_v49, %v2497_v48  ;;  %v1077_v51 = vpack.c.b16 %v1022_v49, %v1022_v49  ;;  %v1025_v53 = vpack.c.b16 %v1023_v52, %v1023_v52  ;;  %v2476_v52 = vld [vmem:[%s2898_s18] sm:$0xff] }
 0x19d   : > { %2295 = vmatmul.msk.bf16.vlgmr.msrb.gmra.mxu2 %vm606_vm3, %v1024_v50  ;;  %2314 = vmatmul.msk.bf16.gmra.mxu3 %vm606_vm3, %v1077_v51 }
 0x19e   : > { %1542 = vmatpush.bf16.msrb.mxu2 %v2867_v25 }
 0x1a2   : > { %1543 = vmatpush.bf16.msrb.mxu2 %v2873_v27 }
 0x1ad   : > { %2296 = vmatmul.msk.bf16.gmra.mxu2 %vm606_vm3, %v1025_v53 }
 0x1bd   : > { %2343 = vmatmul.msk.bf16.vlgmr.msra.gmra.mxu2 %vm606_vm3, %v2468_v54 }
 0x1be   : > { %1719 = vmatpush.bf16.msra.mxu2 %v2867_v25 }
 0x1c2   : > { %1720 = vmatpush.bf16.msra.mxu2 %v2873_v27 }
 0x1cd   : > { %2344 = vmatmul.msk.bf16.gmra.mxu2 %vm606_vm3, %v1145_v57 }
 0x20b   : > { %v1117_v61 = vpop.f32.mrf.mxu3 }
 0x213   : > { %v1119_v3 = vpop.f32.mrf.mxu3 }
 0x220   : > { %v1065_v4 = vpop.f32.mrf.mxu2  ;;  %v1122_v5 = vpop.f32.mrf.mxu3 }
 0x221   : > { %v1118_v28 = vadd.f32 %v1117_v61, %v1065_v4 }
 0x228   : > { %v1067_v7 = vpop.f32.mrf.mxu2  ;;  %v1124_v8 = vpop.f32.mrf.mxu3 }
 0x229   : > { %v1120_v35 = vadd.f32 %v1119_v3, %v1067_v7 }
 0x230   : > { %v1070_v12 = vpop.f32.mrf.mxu2 }
 0x231   : > { %v1123_v42 = vadd.f32 %v1122_v5, %v1070_v12 }
 0x238   : > { %v1072_v19 = vpop.f32.mrf.mxu2 }
 0x240   : > { %v1185_v30 = vpop.f32.mrf.mxu2 }
 0x241   : > { %v1194_v31 = vadd.f32 %v1185_v30, %v1118_v28 }
 0x243   : > { %v1199_v33 = vmul.f32 %v2525_v29, %v1194_v31 }
 0x245   : > { %v1204_v34 = vadd.f32 %v2526_v32, %v1199_v33 }
 0x247   : > { %v1207_v36 = vmax.f32 %v1204_v34, 0.0 }
 0x248   : > { %v1187_v37 = vpop.f32.mrf.mxu2 }
 0x249   : > { %v1210_v38 = vpack.c.bf16 %v1207_v36, %v1207_v36  ;;  %v1195_v39 = vadd.f32 %v1187_v37, %v1120_v35  ;;  %v2477_v37 = vld [vmem:[%s2898_s18 + $0x8] sm:$0xff] }
 0x24b   : > { %v1200_v40 = vmul.f32 %v2525_v29, %v1195_v39  ;;  %2357 = vmatmul.msk.bf16.vlgmr.msra.gmra.mxu0 %vm1228_vm6, %v1210_v38 }
 0x24c   : > { %1601 = vmatpush.bf16.msra.mxu0 %v2867_v25 }
 0x24d   : > { %v1205_v41 = vadd.f32 %v2526_v32, %v1200_v40 }
 0x24f   : > { %v1208_v43 = vmax.f32 %v1205_v41, 0.0 }
 0x250   : > { %v1190_v44 = vpop.f32.mrf.mxu2  ;;  %1602 = vmatpush.bf16.msra.mxu0 %v2873_v27 }
 0x251   : > { %v1214_v45 = vpack.c.bf16 %v1208_v43, %v1208_v43  ;;  %v1196_v46 = vadd.f32 %v1190_v44, %v1123_v42 }
 0x253   : > { %v1201_v47 = vmul.f32 %v2525_v29, %v1196_v46  ;;  %2352 = vmatmul.msk.bf16.vlgmr.msra.gmra.mxu3 %vm1228_vm6, %v1214_v45 }
 0x255   : > { %v1206_v48 = vadd.f32 %v2526_v32, %v1201_v47 }
 0x257   : > { %v1209_v49 = vmax.f32 %v1206_v48, 0.0 }
 0x258   : > { %v1192_v50 = vpop.f32.mrf.mxu2 }
 0x259   : > { %v1276_v51 = vpack.c.bf16 %v1209_v49, %v1209_v49 }
 0x25b   : > { %2365 = vmatmul.msk.bf16.vlgmr.msra.gmra.mxu1 %vm1228_vm6, %v1276_v51  ;;  %1426 = vmatmul.bf16.vlgmr.msrb.gmra.mxu0 %v2594_v15 }
 0x25c   : > { %1660 = vmatpush.bf16.msra.mxu1 %v2867_v25  ;;  %1778 = vmatpush.bf16.msrb.mxu0 %v2867_v25 }
 0x260   : > { %1661 = vmatpush.bf16.msra.mxu1 %v2873_v27  ;;  %1779 = vmatpush.bf16.msrb.mxu0 %v2873_v27 }
 0x263   : > { %2382 = vmatmul.msk.bf16.vlgmr.msrb.gmra.mxu3 %vm1350_vm7, %v2476_v52 }
 0x273   : > { %2383 = vmatmul.msk.bf16.gmra.mxu3 %vm1350_vm7, %v2477_v37 }
 0x2c8   : > { %v1272_v53 = vpop.f32.mrf.mxu0 }
 0x2d0   : > { %v1274_v15 = vpop.f32.mrf.mxu0 }
 0x2d6   : > { %v1244_v54 = vpop.f32.mrf.mxu3 }
 0x2d7   : > { %v1273_v55 = vadd.f32 %v1272_v53, %v1244_v54 }
 0x2d8   : > { %v1305_v56 = vpop.f32.mrf.mxu1  ;;  %v1427_v57 = vpop.f32.mrf.mxu0 }
 0x2d9   : > { %v2906_v58 = vadd.f32 %v1305_v56, %v1273_v55 }
 0x2de   : > { %v1246_v59 = vpop.f32.mrf.mxu3 }
 0x2e0   : > { %v1307_v60 = vpop.f32.mrf.mxu1  ;;  %v1429_v61 = vpop.f32.mrf.mxu0 }
 0x2e6   : > { %v1379_v63 = vpop.f32.mrf.mxu3 }
 0x2e7   : > { %v1380_v0 = vadd.f32 %v2911_v62, %v1379_v63 }
 0x2e9   : > { %v1431_v1 = vadd.f32 %v1427_v57, %v1380_v0 }
 0x2eb   : > { %2534 = vtanh.f32 %v1431_v1  ;;  %1434 = vrot.lane.b32.xlu0 %v1431_v1, %s2596_s23 }
 0x2ee   : > { %v1381_v29 = vpop.f32.mrf.mxu3 }
 0x2ef   : > { %v1382_v30 = vadd.f32 %v2911_v62, %v1381_v29 }
 0x2f1   : > { %v2535_v2 = vpop.eup %2534 }
 0x2f3   : > { %1464 = vrot.lane.b32.xlu0 %v2535_v2, %s2597_s24 }
 0x2f6   : > { %v1384_v56 = vpop.f32.mrf.mxu3 }
 0x2f7   : > { %v1385_v57 = vadd.f32 %v2911_v62, %v1384_v56 }
 0x35d   : > { %v1435_v3 = vpop.permute.xlu0 %1434 }
 0x35e   : > { %v1437_v4 = vadd.f32 %v1435_v3, %v1431_v1 }
 0x360   : > { %v2390_v5 = vmul.f32 -1.442695, %v1437_v4 }
 0x362   : > { %2536 = vpow2.f32 %v2390_v5 }
 0x365   : > { %v1465_v20 = vpop.permute.xlu0 %1464 }
 0x368   : > { %v2537_v6 = vpop.eup %2536 }
 0x369   : > { %v1441_v7 = vadd.f32 1.0, %v2537_v6 }
 0x36b   : > { %2538 = vrcp.f32 %v1441_v7  ;;  %v1453_v11 = vand.u32 2147483648, %v1441_v7  ;;  %v1451_v13 = vand.u32 2147483647, %v1441_v7  ;;  %vm1447_vm9 = vweird.f32 %v1441_v7 }
 0x36d   : > { %v1454_v16 = vor.u32 1.1754944e-38, %v1453_v11  ;;  %vm1452_vm11 = vcmp.eq.f32.partialorder %v1451_v13, 8.507059e+37 }
 0x371   : > { %v2539_v8 = vpop.eup %2538 }
 0x372   : > { %v1443_v9 = vmul.f32 %v2539_v8, %v1441_v7  ;;  %vm1448_vm8 = vweird.f32 %v2539_v8 }
 0x373   : > { %vm1449_vm10 = vmor %vm1447_vm9, %vm1448_vm8 }
 0x374   : > { %v1444_v10 = vsub.f32 1.0, %v1443_v9 }
 0x376   : > { %v1445_v12 = vmul.f32 %v2539_v8, %v1444_v10 }
 0x378   : > { %v1446_v14 = vadd.f32 %v2539_v8, %v1445_v12 }
 0x37a   : > { %v1450_v17 = vsel %vm1449_vm10, %v2539_v8, %v1446_v14 }
 0x37b   : > { %v1455_v18 = vsel %vm1452_vm11, %v1454_v16, %v1450_v17 }
 0x37c   : > { %v1457_v19 = vsub.f32 1.0, %v1455_v18  ;;  %v1467_v21 = vmul.f32 %v1465_v20, %v1455_v18 }
 0x37e   : > { %1459 = vrot.lane.b32.xlu1 %v1457_v19, %s2598_s25 }
 0x386   : > { %1469 = vrot.lane.b32.xlu1 %v1467_v21, %s2598_s25 }
 0x3f0   : > { %v1460_v22 = vpop.permute.xlu1 %1459 }
 0x3f1   : > { %v1462_v23 = vmul.f32 %v2535_v2, %v1460_v22 }
 0x3f8   : > { %v1470_v24 = vpop.permute.xlu1 %1469 }
 0x3f9   : > { %v1472_v26 = vadd.f32 %v1470_v24, %v1462_v23  ;;  %v1386_v24 = vpop.f32.mrf.mxu3 }
 0x3fb   : > { %v1473_v28 = vpack.c.bf16 %v1472_v26, %v1472_v26  ;;  %v1387_v26 = vadd.f32 %v2911_v62, %v1386_v24 }
 0x3fd   : > { %2391 = vmatmul.msk.bf16.vlgmr.msrb.gmra.mxu1 %vm1411_vm12, %v1473_v28 }
 0x3fe   : > { %1837 = vmatpush.bf16.msrb.mxu1 %v2867_v25 }
 0x402   : > { %1838 = vmatpush.bf16.msrb.mxu1 %v2873_v27 }
 0x47a   : > { %v1486_v31 = vpop.f32.mrf.mxu1 }
 0x47b   : > { %v1490_v32 = vadd.f32 %v1486_v31, %v1382_v30 }
 0x47d   : > { %2540 = vtanh.f32 %v1490_v32  ;;  %1493 = vrot.lane.b32.xlu2 %v1490_v32, %s2596_s23 }
 0x482   : > { %v1488_v33 = vpop.f32.mrf.mxu1 }
 0x483   : > { %v2541_v34 = vpop.eup %2540 }
 0x485   : > { %1523 = vrot.lane.b32.xlu2 %v2541_v34, %s2597_s24 }
 0x4d7   : > { %v1494_v35 = vpop.permute.xlu2 %1493 }
 0x4d8   : > { %v1496_v36 = vadd.f32 %v1494_v35, %v1490_v32 }
 0x4da   : > { %v2392_v38 = vmul.f32 -1.442695, %v1496_v36 }
 0x4dc   : > { %2542 = vpow2.f32 %v2392_v38 }
 0x4df   : > { %v1524_v49 = vpop.permute.xlu2 %1523 }
 0x4e2   : > { %v2543_v25 = vpop.eup %2542 }
 0x4e3   : > { %v1500_v27 = vadd.f32 1.0, %v2543_v25 }
 0x4e5   : > { %2544 = vrcp.f32 %v1500_v27  ;;  %v1512_v42 = vand.u32 2147483648, %v1500_v27  ;;  %v1510_v44 = vand.u32 2147483647, %v1500_v27  ;;  %vm1506_vm14 = vweird.f32 %v1500_v27 }
 0x4e7   : > { %v1513_v46 = vor.u32 1.1754944e-38, %v1512_v42  ;;  %vm1511_vm0 = vcmp.eq.f32.partialorder %v1510_v44, 8.507059e+37 }
 0x4eb   : > { %v2545_v39 = vpop.eup %2544 }
 0x4ec   : > { %v1502_v40 = vmul.f32 %v2545_v39, %v1500_v27  ;;  %vm1507_vm13 = vweird.f32 %v2545_v39 }
 0x4ed   : > { %vm1508_vm15 = vmor %vm1506_vm14, %vm1507_vm13 }
 0x4ee   : > { %v1503_v41 = vsub.f32 1.0, %v1502_v40 }
 0x4f0   : > { %v1504_v43 = vmul.f32 %v2545_v39, %v1503_v41 }
 0x4f2   : > { %v1505_v45 = vadd.f32 %v2545_v39, %v1504_v43 }
 0x4f4   : > { %v1509_v47 = vsel %vm1508_vm15, %v2545_v39, %v1505_v45 }
 0x4f5   : > { %v1514_v48 = vsel %vm1511_vm0, %v1513_v46, %v1509_v47 }
 0x4f6   : > { %v1516_v50 = vsub.f32 1.0, %v1514_v48  ;;  %v1526_v51 = vmul.f32 %v1524_v49, %v1514_v48  ;;  %v2478_v48 = vld [vmem:[%s2898_s18 + $0x10] sm:$0xff] }
 0x4f7   : > { %2384 = vmatmul.msk.bf16.gmra.mxu3 %vm1350_vm7, %v2478_v48 }
 0x4f8   : > { %1518 = vrot.lane.b32.xlu0 %v1516_v50, %s2598_s25  ;;  %1528 = vrot.lane.b32.xlu1 %v1526_v51, %s2598_s25 }
 0x56a   : > { %v1519_v52 = vpop.permute.xlu0 %1518  ;;  %v1529_v15 = vpop.permute.xlu1 %1528 }
 0x56b   : > { %v1521_v53 = vmul.f32 %v2541_v34, %v1519_v52 }
 0x56d   : > { %v1531_v54 = vadd.f32 %v1529_v15, %v1521_v53 }
 0x56f   : > { %v1532_v55 = vpack.c.bf16 %v1531_v54, %v1531_v54 }
 0x571   : > { %2393 = vmatmul.msk.bf16.vlgmr.msrb.gmra.mxu2 %vm1411_vm12, %v1532_v55 }
 0x57a   : > { %v1389_v15 = vpop.f32.mrf.mxu3 }
 0x57b   : > { %v1390_v54 = vadd.f32 %v2911_v62, %v1389_v15 }
 0x5f4   : > { %v1545_v59 = vpop.f32.mrf.mxu2 }
 0x5f5   : > { %v1549_v60 = vadd.f32 %v1545_v59, %v1385_v57 }
 0x5f7   : > { %2546 = vtanh.f32 %v1549_v60  ;;  %1552 = vrot.lane.b32.xlu2 %v1549_v60, %s2596_s23 }
 0x5fc   : > { %v1547_v61 = vpop.f32.mrf.mxu2 }
 0x5fd   : > { %v2547_v63 = vpop.eup %2546 }
 0x5fe   : > { %1582 = vrot.lane.b32.xlu0 %v2547_v63, %s2597_s24 }
 0x651   : > { %v1553_v0 = vpop.permute.xlu2 %1552 }
 0x652   : > { %v1555_v1 = vadd.f32 %v1553_v0, %v1549_v60 }
 0x654   : > { %v2394_v2 = vmul.f32 -1.442695, %v1555_v1 }
 0x656   : > { %2548 = vpow2.f32 %v2394_v2 }
 0x65c   : > { %v2549_v3 = vpop.eup %2548 }
 0x65d   : > { %v1559_v4 = vadd.f32 1.0, %v2549_v3 }
 0x65f   : > { %2550 = vrcp.f32 %v1559_v4  ;;  %v1571_v8 = vand.u32 2147483648, %v1559_v4  ;;  %v1569_v10 = vand.u32 2147483647, %v1559_v4  ;;  %vm1565_vm2 = vweird.f32 %v1559_v4 }
 0x661   : > { %v1572_v12 = vor.u32 1.1754944e-38, %v1571_v8  ;;  %vm1570_vm6 = vcmp.eq.f32.partialorder %v1569_v10, 8.507059e+37 }
 0x665   : > { %v2551_v5 = vpop.eup %2550 }
 0x666   : > { %v1561_v6 = vmul.f32 %v2551_v5, %v1559_v4  ;;  %vm1566_vm1 = vweird.f32 %v2551_v5 }
 0x667   : > { %vm1567_vm4 = vmor %vm1565_vm2, %vm1566_vm1 }
 0x668   : > { %v1562_v7 = vsub.f32 1.0, %v1561_v6 }
 0x66a   : > { %v1563_v9 = vmul.f32 %v2551_v5, %v1562_v7 }
 0x66c   : > { %v1564_v11 = vadd.f32 %v2551_v5, %v1563_v9 }
 0x66e   : > { %v1568_v13 = vsel %vm1567_vm4, %v2551_v5, %v1564_v11 }
 0x66f   : > { %v1573_v14 = vsel %vm1570_vm6, %v1572_v12, %v1568_v13 }
 0x670   : > { %v1575_v16 = vsub.f32 1.0, %v1573_v14  ;;  %v1583_v17 = vpop.permute.xlu0 %1582 }
 0x671   : > { %v1585_v18 = vmul.f32 %v1583_v17, %v1573_v14 }
 0x672   : > { %1577 = vrot.lane.b32.xlu1 %v1575_v16, %s2598_s25 }
 0x673   : > { %1587 = vrot.lane.b32.xlu2 %v1585_v18, %s2598_s25 }
 0x6cd   : > { %v1588_v21 = vpop.permute.xlu2 %1587 }
 0x6e4   : > { %v1578_v19 = vpop.permute.xlu1 %1577 }
 0x6e5   : > { %v1580_v20 = vmul.f32 %v2547_v63, %v1578_v19 }
 0x6e7   : > { %v1590_v22 = vadd.f32 %v1588_v21, %v1580_v20  ;;  %v1391_v21 = vpop.f32.mrf.mxu3 }
 0x6e9   : > { %v1591_v23 = vpack.c.bf16 %v1590_v22, %v1590_v22  ;;  %v1392_v22 = vadd.f32 %v2911_v62, %v1391_v21 }
 0x6eb   : > { %2395 = vmatmul.msk.bf16.vlgmr.msra.gmra.mxu0 %vm1411_vm12, %v1591_v23 }
 0x768   : > { %v1604_v28 = vpop.f32.mrf.mxu0 }
 0x769   : > { %v1608_v29 = vadd.f32 %v1604_v28, %v1387_v26 }
 0x76b   : > { %2552 = vtanh.f32 %v1608_v29  ;;  %1611 = vrot.lane.b32.xlu0 %v1608_v29, %s2596_s23 }
 0x770   : > { %v1606_v30 = vpop.f32.mrf.mxu0 }
 0x771   : > { %v2553_v31 = vpop.eup %2552 }
 0x772   : > { %1641 = vrot.lane.b32.xlu1 %v2553_v31, %s2597_s24 }
 0x7dd   : > { %v1612_v32 = vpop.permute.xlu0 %1611 }
 0x7de   : > { %v1614_v33 = vadd.f32 %v1612_v32, %v1608_v29 }
 0x7e0   : > { %v2396_v34 = vmul.f32 -1.442695, %v1614_v33 }
 0x7e2   : > { %2554 = vpow2.f32 %v2396_v34 }
 0x7e4   : > { %v1642_v45 = vpop.permute.xlu1 %1641 }
 0x7e8   : > { %v2555_v35 = vpop.eup %2554 }
 0x7e9   : > { %v1618_v36 = vadd.f32 1.0, %v2555_v35 }
 0x7eb   : > { %2556 = vrcp.f32 %v1618_v36  ;;  %v1630_v27 = vand.u32 2147483648, %v1618_v36  ;;  %v1628_v40 = vand.u32 2147483647, %v1618_v36  ;;  %vm1624_vm9 = vweird.f32 %v1618_v36 }
 0x7ed   : > { %v1631_v42 = vor.u32 1.1754944e-38, %v1630_v27  ;;  %vm1629_vm11 = vcmp.eq.f32.partialorder %v1628_v40, 8.507059e+37 }
 0x7f1   : > { %v2557_v37 = vpop.eup %2556 }
 0x7f2   : > { %v1620_v38 = vmul.f32 %v2557_v37, %v1618_v36  ;;  %vm1625_vm8 = vweird.f32 %v2557_v37 }
 0x7f3   : > { %vm1626_vm10 = vmor %vm1624_vm9, %vm1625_vm8  ;;  %vm1923_vm8 = vcmask 1044480   ;;  %vm1919_vm9 = vcmask 80896  }
 0x7f4   : > { %v1621_v25 = vsub.f32 1.0, %v1620_v38 }
 0x7f6   : > { %v1622_v39 = vmul.f32 %v2557_v37, %v1621_v25 }
 0x7f8   : > { %v1623_v41 = vadd.f32 %v2557_v37, %v1622_v39 }
 0x7fa   : > { %v1627_v43 = vsel %vm1626_vm10, %v2557_v37, %v1623_v41 }
 0x7fb   : > { %v1632_v44 = vsel %vm1629_vm11, %v1631_v42, %v1627_v43 }
 0x7fc   : > { %v1634_v46 = vsub.f32 1.0, %v1632_v44  ;;  %v1644_v47 = vmul.f32 %v1642_v45, %v1632_v44  ;;  %v2479_v45 = vld [vmem:[%s2898_s18 + $0x18] sm:$0xff]  ;;  %s2599_s18 = smov 114  }
 0x7fd   : > { %2385 = vmatmul.msk.bf16.gmra.mxu3 %vm1350_vm7, %v2479_v45 }
 0x7fe   : > { %1636 = vrot.lane.b32.xlu2 %v1634_v46, %s2598_s25  ;;  %1646 = vrot.lane.b32.xlu0 %v1644_v47, %s2598_s25  ;;  %v2408_v46 = vld [vmem:[%s3033_s8] sm:$0xf]  ;;  %v2481_v47 = vld [vmem:[%s3033_s8] sm:$0x10] }
 0x7ff   : > { %v2409_v48 = vor.u32 %v2481_v47, %v2408_v46 }
 0x858   : > { %v1637_v49 = vpop.permute.xlu2 %1636 }
 0x859   : > { %v1639_v50 = vmul.f32 %v2553_v31, %v1637_v49  ;;  %v1925_v49 = vsel %vm1923_vm8, %v2409_v48, 0 }
 0x85a   : > { %1934 = vmatpush.bf16.msra.mxu0 %v1925_v49 }
 0x870   : > { %v1647_v51 = vpop.permute.xlu0 %1646 }
 0x871   : > { %v1649_v52 = vadd.f32 %v1647_v51, %v1639_v50 }
 0x873   : > { %v1650_v53 = vpack.c.bf16 %v1649_v52, %v1649_v52  ;;  %v2527_v52 = vld [vmem:[%s3036_s11 + $0x6] ss:$0 sm:$0xff] }
 0x875   : > { %2397 = vmatmul.msk.bf16.vlgmr.msra.gmra.mxu1 %vm1411_vm12, %v1650_v53 }
 0x8f2   : > { %v1663_v55 = vpop.f32.mrf.mxu1 }
 0x8f3   : > { %v1667_v56 = vadd.f32 %v1663_v55, %v1390_v54  ;;  %v1312_v55 = vmul.f32 %v2527_v52, %v2906_v58 }
 0x8f5   : > { %2558 = vtanh.f32 %v1667_v56  ;;  %1670 = vrot.lane.b32.xlu1 %v1667_v56, %s2596_s23 }
 0x8fa   : > { %v1665_v57 = vpop.f32.mrf.mxu1 }
 0x8fb   : > { %v2559_v59 = vpop.eup %2558 }
 0x8fc   : > { %1700 = vrot.lane.b32.xlu2 %v2559_v59, %s2597_s24 }
 0x956   : > { %v1701_v11 = vpop.permute.xlu2 %1700 }
 0x967   : > { %v1671_v60 = vpop.permute.xlu1 %1670 }
 0x968   : > { %v1673_v61 = vadd.f32 %v1671_v60, %v1667_v56  ;;  %v2528_v56 = vld [vmem:[%s3036_s11 + $0x7] ss:$0 sm:$0xff] }
 0x969   : > { %v1315_v57 = vadd.f32 %v2528_v56, %v1312_v55 }
 0x96a   : > { %v2398_v63 = vmul.f32 -1.442695, %v1673_v61 }
 0x96b   : > { %vm1316_vm7 = vcmp.gt.f32.partialorder %v1315_v57, 0.0 }
 0x96c   : > { %2560 = vpow2.f32 %v2398_v63  ;;  %v1394_v63 = vpop.f32.mrf.mxu3 }
 0x972   : > { %v2561_v0 = vpop.eup %2560 }
 0x973   : > { %v1677_v1 = vadd.f32 1.0, %v2561_v0  ;;  %v1395_v0 = vadd.f32 %v2911_v62, %v1394_v63  ;;  %v2484_v63 = vld [vmem:[%s3035_s10 + $0x10] sm:$0xff] }
 0x975   : > { %2562 = vrcp.f32 %v1677_v1  ;;  %v1689_v5 = vand.u32 2147483648, %v1677_v1  ;;  %v1687_v7 = vand.u32 2147483647, %v1677_v1  ;;  %vm1683_vm14 = vweird.f32 %v1677_v1 }
 0x977   : > { %v1690_v9 = vor.u32 1.1754944e-38, %v1689_v5  ;;  %vm1688_vm0 = vcmp.eq.f32.partialorder %v1687_v7, 8.507059e+37 }
 0x97b   : > { %v2563_v2 = vpop.eup %2562 }
 0x97c   : > { %v1679_v3 = vmul.f32 %v2563_v2, %v1677_v1  ;;  %vm1684_vm13 = vweird.f32 %v2563_v2 }
 0x97d   : > { %vm1685_vm15 = vmor %vm1683_vm14, %vm1684_vm13 }
 0x97e   : > { %v1680_v4 = vsub.f32 1.0, %v1679_v3 }
 0x980   : > { %v1681_v6 = vmul.f32 %v2563_v2, %v1680_v4 }
 0x982   : > { %v1682_v8 = vadd.f32 %v2563_v2, %v1681_v6 }
 0x984   : > { %v1686_v10 = vsel %vm1685_vm15, %v2563_v2, %v1682_v8 }
 0x985   : > { %v1691_v12 = vsel %vm1688_vm0, %v1690_v9, %v1686_v10 }
 0x986   : > { %v1693_v13 = vsub.f32 1.0, %v1691_v12  ;;  %v1703_v14 = vmul.f32 %v1701_v11, %v1691_v12 }
 0x988   : > { %1695 = vrot.lane.b32.xlu0 %v1693_v13, %s2598_s25  ;;  %1705 = vrot.lane.b32.xlu1 %v1703_v14, %s2598_s25 }
 0x9fa   : > { %v1696_v16 = vpop.permute.xlu0 %1695  ;;  %v1706_v18 = vpop.permute.xlu1 %1705 }
 0x9fb   : > { %v1698_v17 = vmul.f32 %v2559_v59, %v1696_v16  ;;  %v1317_v59 = vmul.f32 0.01, %v1315_v57 }
 0x9fd   : > { %v1708_v19 = vadd.f32 %v1706_v18, %v1698_v17  ;;  %v1318_v60 = vsel %vm1316_vm7, %v1315_v57, %v1317_v59 }
 0x9fe   : > { %v1886_v61 = vpack.c.bf16 %v1318_v60, %v1318_v60  ;;  %v2485_v60 = vld [vmem:[%s3035_s10 + $0x18] sm:$0xff] }
 0x9ff   : > { %v1709_v20 = vpack.c.bf16 %v1708_v19, %v1708_v19  ;;  %1989 = vmatpush.bf16.msra.mxu1 %v2485_v60 }
 0xa01   : > { %2399 = vmatmul.msk.bf16.vlgmr.msra.gmra.mxu2 %vm1411_vm12, %v1709_v20 }
 0xa03   : > { %1990 = vmatpush.bf16.msra.mxu1 %v2484_v63 }
 0xa84   : > { %v1722_v23 = vpop.f32.mrf.mxu2 }
 0xa85   : > { %v1726_v24 = vadd.f32 %v1722_v23, %v1392_v22 }
 0xa87   : > { %2564 = vtanh.f32 %v1726_v24  ;;  %1729 = vrot.lane.b32.xlu2 %v1726_v24, %s2596_s23 }
 0xa8c   : > { %v1724_v26 = vpop.f32.mrf.mxu2 }
 0xa8d   : > { %v2565_v28 = vpop.eup %2564 }
 0xa8e   : > { %1759 = vrot.lane.b32.xlu0 %v2565_v28, %s2597_s24 }
 0xae1   : > { %v1730_v29 = vpop.permute.xlu2 %1729 }
 0xae2   : > { %v1732_v30 = vadd.f32 %v1730_v29, %v1726_v24 }
 0xae4   : > { %v2400_v31 = vmul.f32 -1.442695, %v1732_v30 }
 0xae6   : > { %2566 = vpow2.f32 %v2400_v31 }
 0xaec   : > { %v2567_v32 = vpop.eup %2566 }
 0xaed   : > { %v1736_v33 = vadd.f32 1.0, %v2567_v32  ;;  %v1396_v32 = vpop.f32.mrf.mxu3 }
 0xaef   : > { %2568 = vrcp.f32 %v1736_v33  ;;  %v1748_v37 = vand.u32 2147483648, %v1736_v33  ;;  %v1746_v25 = vand.u32 2147483647, %v1736_v33  ;;  %vm1742_vm2 = vweird.f32 %v1736_v33 }
 0xaf1   : > { %v1749_v39 = vor.u32 1.1754944e-38, %v1748_v37  ;;  %vm1747_vm6 = vcmp.eq.f32.partialorder %v1746_v25, 8.507059e+37 }
 0xaf5   : > { %v2569_v34 = vpop.eup %2568 }
 0xaf6   : > { %v1738_v35 = vmul.f32 %v2569_v34, %v1736_v33  ;;  %vm1743_vm1 = vweird.f32 %v2569_v34  ;;  %v1397_v33 = vadd.f32 %v2911_v62, %v1396_v32 }
 0xaf7   : > { %vm1744_vm4 = vmor %vm1742_vm2, %vm1743_vm1  ;;  %vm1894_vm2 = vcmask 48128  }
 0xaf8   : > { %v1739_v36 = vsub.f32 1.0, %v1738_v35 }
 0xafa   : > { %v1740_v38 = vmul.f32 %v2569_v34, %v1739_v36 }
 0xafc   : > { %v1741_v27 = vadd.f32 %v2569_v34, %v1740_v38 }
 0xafe   : > { %v1745_v40 = vsel %vm1744_vm4, %v2569_v34, %v1741_v27 }
 0xaff   : > { %v1750_v41 = vsel %vm1747_vm6, %v1749_v39, %v1745_v40 }
 0xb00   : > { %v1752_v42 = vsub.f32 1.0, %v1750_v41  ;;  %v1760_v43 = vpop.permute.xlu0 %1759 }
 0xb01   : > { %v1762_v44 = vmul.f32 %v1760_v43, %v1750_v41 }
 0xb02   : > { %1754 = vrot.lane.b32.xlu1 %v1752_v42, %s2598_s25 }
 0xb03   : > { %1764 = vrot.lane.b32.xlu2 %v1762_v44, %s2598_s25 }
 0xb5d   : > { %v1765_v53 = vpop.permute.xlu2 %1764 }
 0xb74   : > { %v1755_v50 = vpop.permute.xlu1 %1754 }
 0xb75   : > { %v1757_v51 = vmul.f32 %v2565_v28, %v1755_v50 }
 0xb77   : > { %v1767_v15 = vadd.f32 %v1765_v53, %v1757_v51  ;;  %v1890_v53 = vld [vmem:[%s3034_s9] sm:$0x7] }
 0xb79   : > { %v1768_v54 = vpack.c.bf16 %v1767_v15, %v1767_v15  ;;  %v1899_v15 = vsel %vm1364_vm5, %v1890_v53, 0 }
 0xb7a   : > { %1908 = vmatpush.bf16.msrb.mxu2 %v1899_v15 }
 0xb7b   : > { %2401 = vmatmul.msk.bf16.vlgmr.msrb.gmra.mxu0 %vm1411_vm12, %v1768_v54 }
 0xb8b   : > { %2410 = vmatmul.msk.bf16.vlgmr.msra.gmra.mxu0 %vm1919_vm9, %v1886_v61 }
 0xbf8   : > { %v1781_v1 = vpop.f32.mrf.mxu0 }
 0xbf9   : > { %v1785_v2 = vadd.f32 %v1781_v1, %v1395_v0  ;;  %v2483_v0 = vld [vmem:[%s3035_s10 + $0x8] sm:$0xff]  ;;  %v2482_v1 = vld [vmem:[%s3035_s10] sm:$0xff] }
 0xbfa   : > { %1991 = vmatpush.bf16.msra.mxu1 %v2483_v0 }
 0xbfb   : > { %2570 = vtanh.f32 %v1785_v2  ;;  %1788 = vrot.lane.b32.xlu0 %v1785_v2, %s2596_s23 }
 0xbfe   : > { %1992 = vmatpush.bf16.msra.mxu1 %v2482_v1 }
 0xc00   : > { %v1783_v58 = vpop.f32.mrf.mxu0 }
 0xc01   : > { %v2571_v3 = vpop.eup %2570 }
 0xc02   : > { %1818 = vrot.lane.b32.xlu1 %v2571_v3, %s2597_s24 }
 0xc08   : > { %v2974_v4 = vpop.f32.mrf.mxu0 }
 0xc10   : > { %v1938_v5 = vpop.f32.mrf.mxu0 }
 0xc11   : > { %v2531_v5 = vld [vmem:[%s3036_s11 + $0x9] ss:$0 sm:$0xff] }
 0xc6d   : > { %v1789_v6 = vpop.permute.xlu0 %1788 }
 0xc6e   : > { %v1791_v7 = vadd.f32 %v1789_v6, %v1785_v2  ;;  %v2530_v2 = vld [vmem:[%s3036_s11 + $0x8] ss:$0 sm:$0xff] }
 0xc70   : > { %v2402_v8 = vmul.f32 -1.442695, %v1791_v7 }
 0xc72   : > { %2572 = vpow2.f32 %v2402_v8 }
 0xc74   : > { %v1819_v22 = vpop.permute.xlu1 %1818 }
 0xc78   : > { %v2573_v9 = vpop.eup %2572 }
 0xc79   : > { %v1795_v10 = vadd.f32 1.0, %v2573_v9 }
 0xc7b   : > { %2574 = vrcp.f32 %v1795_v10  ;;  %v1807_v14 = vand.u32 2147483648, %v1795_v10  ;;  %v1805_v17 = vand.u32 2147483647, %v1795_v10  ;;  %vm1801_vm11 = vweird.f32 %v1795_v10 }
 0xc7d   : > { %v1808_v19 = vor.u32 1.1754944e-38, %v1807_v14  ;;  %vm1806_vm14 = vcmp.eq.f32.partialorder %v1805_v17, 8.507059e+37 }
 0xc81   : > { %v2575_v11 = vpop.eup %2574 }
 0xc82   : > { %v1797_v12 = vmul.f32 %v2575_v11, %v1795_v10  ;;  %vm1802_vm10 = vweird.f32 %v2575_v11 }
 0xc83   : > { %vm1803_vm13 = vmor %vm1801_vm11, %vm1802_vm10 }
 0xc84   : > { %v1798_v13 = vsub.f32 1.0, %v1797_v12  ;;  %v2532_v12 = vld [vmem:[%s3036_s11 + $0xa] ss:$0 sm:$0xff] }
 0xc86   : > { %v1799_v16 = vmul.f32 %v2575_v11, %v1798_v13 }
 0xc88   : > { %v1800_v18 = vadd.f32 %v2575_v11, %v1799_v16 }
 0xc8a   : > { %v1804_v20 = vsel %vm1803_vm13, %v2575_v11, %v1800_v18 }
 0xc8b   : > { %v1809_v21 = vsel %vm1806_vm14, %v1808_v19, %v1804_v20 }
 0xc8c   : > { %v1811_v23 = vsub.f32 1.0, %v1809_v21  ;;  %v1821_v24 = vmul.f32 %v1819_v22, %v1809_v21 }
 0xc8e   : > { %1813 = vrot.lane.b32.xlu2 %v1811_v23, %s2598_s25  ;;  %1823 = vrot.lane.b32.xlu0 %v1821_v24, %s2598_s25 }
 0xce8   : > { %v1814_v26 = vpop.permute.xlu2 %1813 }
 0xce9   : > { %v1816_v28 = vmul.f32 %v2571_v3, %v1814_v26 }
 0xd00   : > { %v1824_v29 = vpop.permute.xlu0 %1823 }
 0xd01   : > { %v1826_v30 = vadd.f32 %v1824_v29, %v1816_v28 }
 0xd03   : > { %v1827_v31 = vpack.c.bf16 %v1826_v30, %v1826_v30 }
 0xd05   : > { %2403 = vmatmul.msk.bf16.vlgmr.msrb.gmra.mxu1 %vm1411_vm12, %v1827_v31 }
 0xd82   : > { %v1840_v34 = vpop.f32.mrf.mxu1 }
 0xd83   : > { %v1844_v35 = vadd.f32 %v1840_v34, %v1397_v33 }
 0xd85   : > { %2576 = vtanh.f32 %v1844_v35  ;;  %1847 = vrot.lane.b32.xlu1 %v1844_v35, %s2596_s23 }
 0xd8a   : > { %v1842_v36 = vpop.f32.mrf.mxu1 }
 0xd8b   : > { %v2577_v37 = vpop.eup %2576 }
 0xd8c   : > { %1877 = vrot.lane.b32.xlu2 %v2577_v37, %s2597_s24 }
 0xde6   : > { %v1878_v49 = vpop.permute.xlu2 %1877 }
 0xdf7   : > { %v1848_v38 = vpop.permute.xlu1 %1847 }
 0xdf8   : > { %v1850_v25 = vadd.f32 %v1848_v38, %v1844_v35 }
 0xdfa   : > { %v2404_v27 = vmul.f32 -1.442695, %v1850_v25 }
 0xdfc   : > { %2578 = vpow2.f32 %v2404_v27 }
 0xe02   : > { %v2579_v39 = vpop.eup %2578 }
 0xe03   : > { %v1854_v40 = vadd.f32 1.0, %v2579_v39 }
 0xe05   : > { %2580 = vrcp.f32 %v1854_v40  ;;  %v1866_v62 = vand.u32 2147483648, %v1854_v40  ;;  %v1864_v45 = vand.u32 2147483647, %v1854_v40  ;;  %vm1860_vm15 = vweird.f32 %v1854_v40 }
 0xe07   : > { %v1867_v47 = vor.u32 1.1754944e-38, %v1866_v62  ;;  %vm1865_vm1 = vcmp.eq.f32.partialorder %v1864_v45, 8.507059e+37 }
 0xe0b   : > { %v2581_v41 = vpop.eup %2580 }
 0xe0c   : > { %v1856_v42 = vmul.f32 %v2581_v41, %v1854_v40  ;;  %vm1861_vm12 = vweird.f32 %v2581_v41 }
 0xe0d   : > { %vm1862_vm0 = vmor %vm1860_vm15, %vm1861_vm12 }
 0xe0e   : > { %v1857_v43 = vsub.f32 1.0, %v1856_v42 }
 0xe10   : > { %v1858_v44 = vmul.f32 %v2581_v41, %v1857_v43 }
 0xe12   : > { %v1859_v46 = vadd.f32 %v2581_v41, %v1858_v44 }
 0xe14   : > { %v1863_v48 = vsel %vm1862_vm0, %v2581_v41, %v1859_v46 }
 0xe15   : > { %v1868_v50 = vsel %vm1865_vm1, %v1867_v47, %v1863_v48 }
 0xe16   : > { %v1870_v51 = vsub.f32 1.0, %v1868_v50  ;;  %v1880_v52 = vmul.f32 %v1878_v49, %v1868_v50 }
 0xe18   : > { %1872 = vrot.lane.b32.xlu0 %v1870_v51, %s2598_s25  ;;  %1882 = vrot.lane.b32.xlu1 %v1880_v52, %s2598_s25  ;;  %s435_s25 = scalar_lea.vmem %s3037_s12, %s2100_s20 }
 0xe8a   : > { %v1873_v54 = vpop.permute.xlu0 %1872  ;;  %v1883_v56 = vpop.permute.xlu1 %1882 }
 0xe8b   : > { %v1875_v55 = vmul.f32 %v2577_v37, %v1873_v54 }
 0xe8d   : > { %v1885_v57 = vadd.f32 %v1883_v56, %v1875_v55 }
 0xe8f   : > { %v1889_v59 = vpack.c.bf16 %v1885_v57, %v1885_v57 }
 0xe91   : > { %1892 = vrot.lane.b32.xlu2 %v1889_v59, %s2599_s18 }
 0xe99   : > { %2022 = vrot.lane.b32.xlu2 %v1885_v57, %s2600_s19 }
 0xeeb   : > { %v1893_v61 = vpop.permute.xlu2 %1892 }
 0xeec   : > { %2405 = vmatmul.msk.bf16.vlgmr.msrb.gmra.mxu2 %vm1894_vm2, %v1893_v61 }
 0xef3   : > { %v2023_v33 = vpop.permute.xlu2 %2022 }
 0xf6f   : > { %v1910_v58 = vpop.f32.mrf.mxu2 }
 0xf70   : > { %v1937_v3 = vadd.f32 %v2974_v4, %v1910_v58  ;;  %v2533_v4 = vld [vmem:[%s3036_s11 + $0xb] ss:$0 sm:$0xff] }
 0xf72   : > { %v1942_v6 = vmul.f32 %v2530_v2, %v1937_v3 }
 0xf74   : > { %v1945_v7 = vadd.f32 %v2531_v5, %v1942_v6 }
 0xf76   : > { %vm1946_vm5 = vcmp.gt.f32.partialorder %v1945_v7, 0.0  ;;  %v1947_v8 = vmul.f32 0.01, %v1945_v7 }
 0xf77   : > { %v1912_v9 = vpop.f32.mrf.mxu2 }
 0xf78   : > { %v1948_v10 = vsel %vm1946_vm5, %v1945_v7, %v1947_v8 }
 0xf79   : > { %v1949_v11 = vpack.c.bf16 %v1948_v10, %v1948_v10 }
 0xf7b   : > { %2427 = vmatmul.msk.bf16.vlgmr.msra.gmra.mxu1 %vm606_vm3, %v1949_v11  ;;  %vm2025_vm3 = vcmask 244816  }
 0xff8   : > { %v1994_v13 = vpop.f32.mrf.mxu1 }
 0xff9   : > { %v2000_v14 = vmul.f32 %v2532_v12, %v1994_v13 }
 0xffb   : > { %v2003_v16 = vadd.f32 %v2533_v4, %v2000_v14 }
 0xffd   : > { %v2005_v17 = vmul.f32 0.01, %v2003_v16  ;;  %vm2004_vm4 = vcmp.gt.f32.partialorder %v2003_v16, 0.0 }
 0xfff   : > { %v2006_v18 = vsel %vm2004_vm4, %v2003_v16, %v2005_v17 }
0x1000   : > { %v1996_v19 = vpop.f32.mrf.mxu1  ;;  %v2007_v20 = vsel %vm1919_vm9, %v2006_v18, -inf }
0x1001   : > { %2008 = vmax.xlane.f32.xlu0 %v2007_v20 }
0x1074   : > { %v2009_v21 = vpop.xlane.xlu0 %2008 }
0x1075   : > { %v2010_v22 = vsub.f32 %v2006_v18, %v2009_v21 }
0x1077   : > { %v2011_v23 = vmul.f32 1.442695, %v2010_v22 }
0x1079   : > { %2582 = vpow2.f32 %v2011_v23 }
0x107f   : > { %v2583_v24 = vpop.eup %2582 }
0x1080   : > { %v2013_v26 = vsel %vm1919_vm9, %v2583_v24, 0.0 }
0x1081   : > { %2014 = vadd.xlane.f32.xlu1 %v2013_v26 }
0x10f4   : > { %v2015_v28 = vpop.xlane.xlu1 %2014 }
0x10f5   : > { %2584 = vlog2.f32 %v2015_v28 }
0x10fb   : > { %v2585_v29 = vpop.eup %2584 }
0x10fc   : > { %v2017_v30 = vmul.f32 0.6931472, %v2585_v29 }
0x10fe   : > { %v2018_v31 = vadd.f32 %v2017_v30, %v2009_v21 }
0x1100   : > { %v2019_v32 = vsub.f32 %v2006_v18, %v2018_v31 }
0x1102   : > { %2020 = vst.msk [vmem:[%s435_s25] sm:$0xff] %vm1919_vm9, %v2019_v32 }
0x1103   : > { %2026 = vst.msk [vmem:[%s435_s25] sm:$0xff] %vm2025_vm3, %v2023_v33 }
0x1104 PF: > { %s22_s21 = sadd.s32 1, %s2592_s21  }
0x1105   : > { %p19_p6 = scmp.ge.s32.totalorder %s22_s21, 4  }
0x1107   :  { %21 = sbr.rel (!%p19_p6) target bundleno = 1 (0x1), region = 109 }

</bundles_post_ra>
